<compile_context>
chip_gen: v6e
topology: v6e:2x2x1
jax: 0.10.0
libtpu: 0.0.40
codegen_flags: <defaults>
</compile_context>

<pallas_src>
import jax
import jax.numpy as jnp
from jax.experimental import pallas as pl
from jax.experimental.pallas import tpu as pltpu

TEMPERATURE = 1.0
NUM_CLASSES = 10
HIDDEN = 32
LAMBDA_VIRTUAL = 0.5
N_LAM = 10

HPAD = 128                 # hidden dim padded to a full lane tile
CPAD = 128                 # class dim padded to a full lane tile
NOUT = 8                   # packed per-sample output lanes
NEG_INF = -1e30            # finite "minus infinity" for masked log-sum-exp lanes

VMEM_BUDGET = 24 * 1024 * 1024   # per-tile working-set target (fits v5e/v6e/v7x)
VMEM_LIMIT = 48 * 1024 * 1024    # explicit scoped-VMEM limit (< v7x 64 MiB/TC)


def _round_up(x, m):
    return (x + m - 1) // m * m


def _pick_tile_b(batch, dp):
    """Largest batch tile that fits the VMEM budget; >=2 tiles for small
    batches (feeds both v7x TensorCores); evened-out tiles for big batches."""
    # Per-row VMEM: x1+x2 bf16 tiles double-buffered + h1/h2 f32 scratch + misc.
    per_row = 8 * dp + 2 * HPAD * 4 + 128
    # Fixed: W1 bf16 + W2 f32 (double-buffered, block index never changes) + slack.
    fixed = dp * HPAD * 2 * 2 + HPAD * CPAD * 4 * 2 + (1 << 16)
    # TODO(synk): for very large dp (ImageNet-scale flatten) W1 alone can blow
    # VMEM; that would need a K-tiled first matmul with an accumulator axis.
    cap = max(8, (VMEM_BUDGET - fixed) // per_row // 8 * 8)
    cap = min(cap, 1024)
    bp8 = _round_up(batch, 8)
    if bp8 <= cap:
        return 8 if bp8 <= 8 else _round_up(pl.cdiv(bp8, 2), 8)
    n_tiles = pl.cdiv(bp8, cap)
    return _round_up(pl.cdiv(bp8, n_tiles), 8)


# ----------------------------------------------------------------------------
# Fused kernel: classifier + CE + energy + mixup lambda search + virtual eval
# ----------------------------------------------------------------------------
def _fused_kernel(x1_ref, x2_ref, y_ref, w1_ref, b1_ref, w2_ref, b2_ref,
                  out_ref, h1_ref, h2_ref):
    tb = out_ref.shape[0]

    # The only dp-wide matmuls: each x element feeds exactly one MXU pass.
    h1_ref[...] = jnp.dot(x1_ref[...], w1_ref[...],
                          preferred_element_type=jnp.float32)
    h2_ref[...] = jnp.dot(x2_ref[...], w1_ref[...],
                          preferred_element_type=jnp.float32)

    cls = jax.lax.broadcasted_iota(jnp.int32, (tb, CPAD), 1)
    valid_cls = cls < NUM_CLASSES

    def head(h):
        feat = jnp.maximum(h + b1_ref[...], 0.0)
        logits = jnp.dot(feat, w2_ref[...],
                         preferred_element_type=jnp.float32) + b2_ref[...]
        return feat, logits

    def energy_of(logits):
        # E(x) = -T * logsumexp(clamp(logits,-10,10)/T) over the REAL classes.
        lc = jnp.where(valid_cls, jnp.clip(logits, -10.0, 10.0) / TEMPERATURE,
                       NEG_INF)
        m = jnp.max(lc, axis=1, keepdims=True)
        return -TEMPERATURE * (
            m + jnp.log(jnp.sum(jnp.exp(lc - m), axis=1, keepdims=True)))

    # ---- identity (x1) branch: per-sample energy + cross-entropy ------------
    _, logits_id = head(h1_ref[...])
    energy_id = energy_of(logits_id)
    lm = jnp.where(valid_cls, logits_id, NEG_INF)          # CE on UNclamped logits
    m = jnp.max(lm, axis=1, keepdims=True)
    lse = m + jnp.log(jnp.sum(jnp.exp(lm - m), axis=1, keepdims=True))
    onehot = (cls == y_ref[...]).astype(jnp.float32)
    ce = lse - jnp.sum(onehot * logits_id, axis=1, keepdims=True)

    # ---- energy-guided mixup search, fully unrolled over the 10 lambdas -----
    # Linearity: (lam*x1 + (1-lam)*x2) @ W1 + b1 == lam*h1 + (1-lam)*h2 + b1,
    # so per-lambda work is a (tb,128) mix + a (tb,128)x(128,128) matmul only.
    best_e = jnp.full((tb, 1), -jnp.inf, jnp.float32)
    best_lam = jnp.zeros((tb, 1), jnp.float32)
    for l in range(N_LAM):                     # trace-time unrolled lambda loop
        lam = 0.2 + 0.6 * l / (N_LAM - 1)      # torch.linspace(0.2, 0.8, 10)
        _, logits_m = head(lam * h1_ref[...] + (1.0 - lam) * h2_ref[...])
        e = energy_of(logits_m)
        better = e > best_e                    # strict >, matches torch update
        best_e = jnp.where(better, e, best_e)
        best_lam = jnp.where(better, lam, best_lam)

    # ---- virtual sample at best lambda + consistency sum --------------------
    feat_id = jnp.maximum(h1_ref[...] + b1_ref[...], 0.0)
    feat_v, logits_v = head(best_lam * h1_ref[...] + (1.0 - best_lam) * h2_ref[...])
    v_energy = energy_of(logits_v)
    d = feat_id - feat_v                       # padded hidden lanes are 0 for both
    msq = jnp.sum(d * d, axis=1, keepdims=True)

    # ---- pack the four per-sample scalars into one small lane block ---------
    lane = jax.lax.broadcasted_iota(jnp.int32, (tb, NOUT), 1)
    zeros = jnp.zeros((tb, NOUT), jnp.float32)
    out_ref[...] = (jnp.where(lane == 0, energy_id, zeros)
                    + jnp.where(lane == 1, ce, zeros)
                    + jnp.where(lane == 2, v_energy, zeros)
                    + jnp.where(lane == 3, msq, zeros))


def _run_fused(x1, x2, y_col, w1_bf, b1, w2, b2, tile_b):
    bp, dp = x1.shape
    n_tiles = bp // tile_b
    row = lambda i: (i, 0)
    zero = lambda i: (0, 0)
    grid_spec = pltpu.PrefetchScalarGridSpec(
        num_scalar_prefetch=0,
        grid=(n_tiles,),
        in_specs=[
            pl.BlockSpec((tile_b, dp), row),        # x1 tile (bf16)
            pl.BlockSpec((tile_b, dp), row),        # x2 tile (bf16)
            pl.BlockSpec((tile_b, 1), row),         # labels (int32 column)
            pl.BlockSpec((dp, HPAD), zero),         # W1 (bf16), fetched once
            pl.BlockSpec((1, HPAD), zero),          # b1
            pl.BlockSpec((HPAD, CPAD), zero),       # W2
            pl.BlockSpec((1, CPAD), zero),          # b2
        ],
        out_specs=pl.BlockSpec((tile_b, NOUT), row),
        scratch_shapes=[pltpu.VMEM((tile_b, HPAD), jnp.float32),   # h1 = x1@W1
                        pltpu.VMEM((tile_b, HPAD), jnp.float32)],  # h2 = x2@W1
    )
    return pl.pallas_call(
        _fused_kernel,
        grid_spec=grid_spec,
        out_shape=jax.ShapeDtypeStruct((bp, NOUT), jnp.float32),
        compiler_params=pltpu.CompilerParams(
            dimension_semantics=("parallel",),
            vmem_limit_bytes=VMEM_LIMIT),
    )(x1, x2, y_col, w1_bf, b1, w2, b2)


# ----------------------------------------------------------------------------
# Module forward (one fused kernel + tiny O(B) JAX glue)
# ----------------------------------------------------------------------------
def energy_constrained_dro_forward(x, y, params):
    w1, b1, w2, b2 = params
    batch = x.shape[0]
    d = x.shape[1] * x.shape[2] * x.shape[3]
    dp = w1.shape[0]
    tile_b = _pick_tile_b(batch, dp)
    bp = _round_up(batch, tile_b)

    # Padded bf16 operands built directly (no f32 (bp, dp) intermediates).
    x_flat = x.reshape(batch, d).astype(jnp.bfloat16)
    # TODO(synk): the torch.rand(1)<0.5 branch selection, the autograd-based
    # energy-guided-perturbation branch, torch.randperm host RNG and the
    # persistent momentum buffers (register_buffer state across calls) are not
    # reproduced; we always take the mixup branch with a fixed permutation.
    perm = jax.random.permutation(jax.random.PRNGKey(1), batch)
    x1 = jnp.zeros((bp, dp), jnp.bfloat16).at[:batch, :d].set(x_flat)
    x2 = jnp.zeros((bp, dp), jnp.bfloat16).at[:batch, :d].set(x_flat[perm])
    y_col = jnp.zeros((bp, 1), jnp.int32).at[:batch, 0].set(y.astype(jnp.int32))
    w1_bf = w1.astype(jnp.bfloat16)

    out = _run_fused(x1, x2, y_col, w1_bf, b1, w2, b2, tile_b)[:batch]
    energies = out[:, 0]
    ce_per = out[:, 1]
    v_energy = out[:, 2]
    msq = out[:, 3]

    # update_id_statistics + adaptive_energy_threshold (first-call behaviour:
    # mean/std from the current batch; all labels < num_classes so every
    # sample is in-distribution).  torch .std() is unbiased; batch==1 guarded.
    n = jnp.float32(batch)
    e_mean = jnp.mean(energies)
    e_std = jnp.sqrt(jnp.sum((energies - e_mean) ** 2)
                     / jnp.float32(max(batch - 1, 1)))
    threshold = jnp.clip(e_mean + 1.5 * e_std, -5.0, 5.0)   # adaptive_threshold=True

    ce_loss = jnp.mean(ce_per)                               # F.cross_entropy
    virtual_loss = jnp.mean(jnp.maximum(threshold - v_energy, 0.0))
    consistency_loss = 0.1 * jnp.sum(msq) / (n * HIDDEN)     # == 0.1 * F.mse_loss

    return ce_loss + LAMBDA_VIRTUAL * virtual_loss + consistency_loss


def init_params(key, d_in):
    dp = _round_up(d_in, 128)
    k1, k2 = jax.random.split(key)
    w1 = jnp.zeros((dp, HPAD), jnp.float32).at[:d_in, :HIDDEN].set(
        jax.random.normal(k1, (d_in, HIDDEN), jnp.float32)
        / jnp.sqrt(jnp.float32(d_in)))
    b1 = jnp.zeros((1, HPAD), jnp.float32)
    w2 = jnp.zeros((HPAD, CPAD), jnp.float32).at[:HIDDEN, :NUM_CLASSES].set(
        jax.random.normal(k2, (HIDDEN, NUM_CLASSES), jnp.float32)
        / jnp.sqrt(jnp.float32(HIDDEN)))
    b2 = jnp.zeros((1, CPAD), jnp.float32)
    return w1, b1, w2, b2


if __name__ == "__main__":
    key = jax.random.PRNGKey(0)
    kx, ky, kp = jax.random.split(key, 3)

    B, C, H, W = 4, 4, 16, 16
    x = jax.random.uniform(kx, (B, C, H, W), jnp.float32)      # NCHW, like PyTorch
    y = jax.random.randint(ky, (B,), 0, NUM_CLASSES)           # all ID labels

    params = init_params(kp, C * H * W)
    fwd = jax.jit(energy_constrained_dro_forward)
    loss = jax.block_until_ready(fwd(x, y, params))
    assert jnp.isfinite(loss)
    print("KERNEL_OK")
</pallas_src>

<mosaic_0001>
module attributes {stable_mosaic.version = 11 : i64} {
  func.func @_fused_kernel(%arg0: i32, %arg1: memref<8x1024xbf16, #tpu.memory_space<vmem>>, %arg2: memref<8x1024xbf16, #tpu.memory_space<vmem>>, %arg3: memref<8x1xi32, #tpu.memory_space<vmem>>, %arg4: memref<1024x128xbf16, #tpu.memory_space<vmem>>, %arg5: memref<1x128xf32, #tpu.memory_space<vmem>>, %arg6: memref<128x128xf32, #tpu.memory_space<vmem>>, %arg7: memref<1x128xf32, #tpu.memory_space<vmem>>, %arg8: memref<8x8xf32, #tpu.memory_space<vmem>>, %arg9: memref<8x128xf32, #tpu.memory_space<vmem>>, %arg10: memref<8x128xf32, #tpu.memory_space<vmem>>) attributes {dimension_semantics = [#tpu.dimension_semantics<parallel>], iteration_bounds = array<i64: 1>, scalar_prefetch = 0 : i64, scratch_operands = 2 : i64, tpu.core_type = #tpu.core_type<tc>, window_params = [{transform_indices = @transform_0, window_bounds = array<i64: 8, 1024>}, {transform_indices = @transform_1, window_bounds = array<i64: 8, 1024>}, {transform_indices = @transform_2, window_bounds = array<i64: 8, 1>}, {pipeline_mode = #tpu.pipeline_mode<synchronous>, transform_indices = @transform_3, window_bounds = array<i64: 1024, 128>}, {pipeline_mode = #tpu.pipeline_mode<synchronous>, transform_indices = @transform_4, window_bounds = array<i64: 1, 128>}, {pipeline_mode = #tpu.pipeline_mode<synchronous>, transform_indices = @transform_5, window_bounds = array<i64: 128, 128>}, {pipeline_mode = #tpu.pipeline_mode<synchronous>, transform_indices = @transform_6, window_bounds = array<i64: 1, 128>}, {transform_indices = @transform_7, window_bounds = array<i64: 8, 8>}]} {
    %c0 = arith.constant 0 : index
    %c0_0 = arith.constant 0 : index
    %0 = vector.load %arg1[%c0, %c0_0] : memref<8x1024xbf16, #tpu.memory_space<vmem>>, vector<8x1024xbf16>
    %c0_1 = arith.constant 0 : index
    %c0_2 = arith.constant 0 : index
    %1 = vector.load %arg4[%c0_1, %c0_2] : memref<1024x128xbf16, #tpu.memory_space<vmem>>, vector<1024x128xbf16>
    %cst = arith.constant dense<0.000000e+00> : vector<8x128xf32>
    %2 = tpu.matmul %0, %1, %cst {dimension_numbers = #tpu.dot_dimension_numbers<[1], [0], [0], [1], [0, 0, 1, 1], [], []>} : vector<8x1024xbf16>, vector<1024x128xbf16>, vector<8x128xf32> -> vector<8x128xf32>
    %c0_3 = arith.constant 0 : index
    %c0_4 = arith.constant 0 : index
    %3 = vector.load %arg9[%c0_3, %c0_4] : memref<8x128xf32, #tpu.memory_space<vmem>>, vector<8x128xf32>
    tpu.vector_store %arg9[%c0_3, %c0_4], %2 {strides = array<i32>} : memref<8x128xf32, #tpu.memory_space<vmem>>, vector<8x128xf32>,
    %c0_5 = arith.constant 0 : index
    %c0_6 = arith.constant 0 : index
    %4 = vector.load %arg2[%c0_5, %c0_6] : memref<8x1024xbf16, #tpu.memory_space<vmem>>, vector<8x1024xbf16>
    %c0_7 = arith.constant 0 : index
    %c0_8 = arith.constant 0 : index
    %5 = vector.load %arg4[%c0_7, %c0_8] : memref<1024x128xbf16, #tpu.memory_space<vmem>>, vector<1024x128xbf16>
    %cst_9 = arith.constant dense<0.000000e+00> : vector<8x128xf32>
    %6 = tpu.matmul %4, %5, %cst_9 {dimension_numbers = #tpu.dot_dimension_numbers<[1], [0], [0], [1], [0, 0, 1, 1], [], []>} : vector<8x1024xbf16>, vector<1024x128xbf16>, vector<8x128xf32> -> vector<8x128xf32>
    %c0_10 = arith.constant 0 : index
    %c0_11 = arith.constant 0 : index
    %7 = vector.load %arg10[%c0_10, %c0_11] : memref<8x128xf32, #tpu.memory_space<vmem>>, vector<8x128xf32>
    tpu.vector_store %arg10[%c0_10, %c0_11], %6 {strides = array<i32>} : memref<8x128xf32, #tpu.memory_space<vmem>>, vector<8x128xf32>,
    %8 = tpu.iota {dimensions = array<i32: 1>} : vector<8x128xi32>
    %c10_i32 = arith.constant 10 : i32
    %9 = vector.broadcast %c10_i32 : i32 to vector<8x128xi32>
    %10 = arith.cmpi slt, %8, %9 : vector<8x128xi32>
    %c0_12 = arith.constant 0 : index
    %c0_13 = arith.constant 0 : index
    %11 = vector.load %arg9[%c0_12, %c0_13] : memref<8x128xf32, #tpu.memory_space<vmem>>, vector<8x128xf32>
    %c0_14 = arith.constant 0 : index
    %c0_15 = arith.constant 0 : index
    %12 = vector.load %arg5[%c0_14, %c0_15] : memref<1x128xf32, #tpu.memory_space<vmem>>, vector<1x128xf32>
    %13 = vector.broadcast %12 : vector<1x128xf32> to vector<8x128xf32>
    %14 = arith.addf %11, %13 : vector<8x128xf32>
    %cst_16 = arith.constant 0.000000e+00 : f32
    %15 = vector.broadcast %cst_16 : f32 to vector<8x128xf32>
    %16 = arith.maximumf %14, %15 : vector<8x128xf32>
    %c0_17 = arith.constant 0 : index
    %c0_18 = arith.constant 0 : index
    %17 = vector.load %arg6[%c0_17, %c0_18] : memref<128x128xf32, #tpu.memory_space<vmem>>, vector<128x128xf32>
    %cst_19 = arith.constant dense<0.000000e+00> : vector<8x128xf32>
    %18 = tpu.matmul %16, %17, %cst_19 {dimension_numbers = #tpu.dot_dimension_numbers<[1], [0], [0], [1], [0, 0, 1, 1], [], []>} : vector<8x128xf32>, vector<128x128xf32>, vector<8x128xf32> -> vector<8x128xf32>
    %c0_20 = arith.constant 0 : index
    %c0_21 = arith.constant 0 : index
    %19 = vector.load %arg7[%c0_20, %c0_21] : memref<1x128xf32, #tpu.memory_space<vmem>>, vector<1x128xf32>
    %20 = vector.broadcast %19 : vector<1x128xf32> to vector<8x128xf32>
    %21 = arith.addf %18, %20 : vector<8x128xf32>
    %cst_22 = arith.constant -1.000000e+01 : f32
    %cst_23 = arith.constant 1.000000e+01 : f32
    %22 = vector.broadcast %cst_22 : f32 to vector<8x128xf32>
    %23 = arith.maximumf %22, %21 : vector<8x128xf32>
    %24 = vector.broadcast %cst_23 : f32 to vector<8x128xf32>
    %25 = arith.minimumf %24, %23 : vector<8x128xf32>
    %cst_24 = arith.constant 1.000000e+00 : f32
    %26 = vector.broadcast %cst_24 : f32 to vector<8x128xf32>
    %27 = arith.divf %25, %26 : vector<8x128xf32>
    %cst_25 = arith.constant -1.000000e+30 : f32
    %28 = vector.broadcast %cst_25 : f32 to vector<8x128xf32>
    %29 = arith.select %10, %27, %28 : vector<8x128xi1>, vector<8x128xf32>
    %cst_26 = arith.constant dense<0xFF800000> : vector<8xf32>
    %30 = vector.multi_reduction <maximumf>, %29, %cst_26 [1] : vector<8x128xf32> to vector<8xf32>
    %31 = vector.shape_cast %30 : vector<8xf32> to vector<8x1xf32>
    %32 = vector.broadcast %31 : vector<8x1xf32> to vector<8x128xf32>
    %33 = arith.subf %29, %32 : vector<8x128xf32>
    %34 = math.exp %33 : vector<8x128xf32>
    %cst_27 = arith.constant dense<0.000000e+00> : vector<8xf32>
    %35 = vector.multi_reduction <add>, %34, %cst_27 [1] : vector<8x128xf32> to vector<8xf32>
    %36 = vector.shape_cast %35 : vector<8xf32> to vector<8x1xf32>
    %37 = math.log %36 : vector<8x1xf32>
    %38 = arith.addf %31, %37 : vector<8x1xf32>
    %cst_28 = arith.constant -1.000000e+00 : f32
    %39 = vector.broadcast %cst_28 : f32 to vector<8x1xf32>
    %40 = arith.mulf %39, %38 : vector<8x1xf32>
    %cst_29 = arith.constant -1.000000e+30 : f32
    %41 = vector.broadcast %cst_29 : f32 to vector<8x128xf32>
    %42 = arith.select %10, %21, %41 : vector<8x128xi1>, vector<8x128xf32>
    %cst_30 = arith.constant dense<0xFF800000> : vector<8xf32>
    %43 = vector.multi_reduction <maximumf>, %42, %cst_30 [1] : vector<8x128xf32> to vector<8xf32>
    %44 = vector.shape_cast %43 : vector<8xf32> to vector<8x1xf32>
    %45 = vector.broadcast %44 : vector<8x1xf32> to vector<8x128xf32>
    %46 = arith.subf %42, %45 : vector<8x128xf32>
    %47 = math.exp %46 : vector<8x128xf32>
    %cst_31 = arith.constant dense<0.000000e+00> : vector<8xf32>
    %48 = vector.multi_reduction <add>, %47, %cst_31 [1] : vector<8x128xf32> to vector<8xf32>
    %49 = vector.shape_cast %48 : vector<8xf32> to vector<8x1xf32>
    %50 = math.log %49 : vector<8x1xf32>
    %51 = arith.addf %44, %50 : vector<8x1xf32>
    %c0_32 = arith.constant 0 : index
    %c0_33 = arith.constant 0 : index
    %52 = vector.load %arg3[%c0_32, %c0_33] : memref<8x1xi32, #tpu.memory_space<vmem>>, vector<8x1xi32>
    %53 = vector.broadcast %52 : vector<8x1xi32> to vector<8x128xi32>
    %54 = arith.cmpi eq, %8, %53 : vector<8x128xi32>
    %55 = arith.extui %54 : vector<8x128xi1> to vector<8x128xi32>
    %56 = arith.sitofp %55 : vector<8x128xi32> to vector<8x128xf32>
    %57 = arith.mulf %56, %21 : vector<8x128xf32>
    %cst_34 = arith.constant dense<0.000000e+00> : vector<8xf32>
    %58 = vector.multi_reduction <add>, %57, %cst_34 [1] : vector<8x128xf32> to vector<8xf32>
    %59 = vector.shape_cast %58 : vector<8xf32> to vector<8x1xf32>
    %60 = arith.subf %51, %59 : vector<8x1xf32>
    %cst_35 = arith.constant 0xFF800000 : f32
    %61 = vector.broadcast %cst_35 : f32 to vector<8x1xf32>
    %cst_36 = arith.constant 0.000000e+00 : f32
    %62 = vector.broadcast %cst_36 : f32 to vector<8x1xf32>
    %c0_37 = arith.constant 0 : index
    %c0_38 = arith.constant 0 : index
    %63 = vector.load %arg9[%c0_37, %c0_38] : memref<8x128xf32, #tpu.memory_space<vmem>>, vector<8x128xf32>
    %cst_39 = arith.constant 2.000000e-01 : f32
    %64 = vector.broadcast %cst_39 : f32 to vector<8x128xf32>
    %65 = arith.mulf %64, %63 : vector<8x128xf32>
    %c0_40 = arith.constant 0 : index
    %c0_41 = arith.constant 0 : index
    %66 = vector.load %arg10[%c0_40, %c0_41] : memref<8x128xf32, #tpu.memory_space<vmem>>, vector<8x128xf32>
    %cst_42 = arith.constant 8.000000e-01 : f32
    %67 = vector.broadcast %cst_42 : f32 to vector<8x128xf32>
    %68 = arith.mulf %67, %66 : vector<8x128xf32>
    %69 = arith.addf %65, %68 : vector<8x128xf32>
    %c0_43 = arith.constant 0 : index
    %c0_44 = arith.constant 0 : index
    %70 = vector.load %arg5[%c0_43, %c0_44] : memref<1x128xf32, #tpu.memory_space<vmem>>, vector<1x128xf32>
    %71 = vector.broadcast %70 : vector<1x128xf32> to vector<8x128xf32>
    %72 = arith.addf %69, %71 : vector<8x128xf32>
    %cst_45 = arith.constant 0.000000e+00 : f32
    %73 = vector.broadcast %cst_45 : f32 to vector<8x128xf32>
    %74 = arith.maximumf %72, %73 : vector<8x128xf32>
    %c0_46 = arith.constant 0 : index
    %c0_47 = arith.constant 0 : index
    %75 = vector.load %arg6[%c0_46, %c0_47] : memref<128x128xf32, #tpu.memory_space<vmem>>, vector<128x128xf32>
    %cst_48 = arith.constant dense<0.000000e+00> : vector<8x128xf32>
    %76 = tpu.matmul %74, %75, %cst_48 {dimension_numbers = #tpu.dot_dimension_numbers<[1], [0], [0], [1], [0, 0, 1, 1], [], []>} : vector<8x128xf32>, vector<128x128xf32>, vector<8x128xf32> -> vector<8x128xf32>
    %c0_49 = arith.constant 0 : index
    %c0_50 = arith.constant 0 : index
    %77 = vector.load %arg7[%c0_49, %c0_50] : memref<1x128xf32, #tpu.memory_space<vmem>>, vector<1x128xf32>
    %78 = vector.broadcast %77 : vector<1x128xf32> to vector<8x128xf32>
    %79 = arith.addf %76, %78 : vector<8x128xf32>
    %cst_51 = arith.constant -1.000000e+01 : f32
    %cst_52 = arith.constant 1.000000e+01 : f32
    %80 = vector.broadcast %cst_51 : f32 to vector<8x128xf32>
    %81 = arith.maximumf %80, %79 : vector<8x128xf32>
    %82 = vector.broadcast %cst_52 : f32 to vector<8x128xf32>
    %83 = arith.minimumf %82, %81 : vector<8x128xf32>
    %cst_53 = arith.constant 1.000000e+00 : f32
    %84 = vector.broadcast %cst_53 : f32 to vector<8x128xf32>
    %85 = arith.divf %83, %84 : vector<8x128xf32>
    %cst_54 = arith.constant -1.000000e+30 : f32
    %86 = vector.broadcast %cst_54 : f32 to vector<8x128xf32>
    %87 = arith.select %10, %85, %86 : vector<8x128xi1>, vector<8x128xf32>
    %cst_55 = arith.constant dense<0xFF800000> : vector<8xf32>
    %88 = vector.multi_reduction <maximumf>, %87, %cst_55 [1] : vector<8x128xf32> to vector<8xf32>
    %89 = vector.shape_cast %88 : vector<8xf32> to vector<8x1xf32>
    %90 = vector.broadcast %89 : vector<8x1xf32> to vector<8x128xf32>
    %91 = arith.subf %87, %90 : vector<8x128xf32>
    %92 = math.exp %91 : vector<8x128xf32>
    %cst_56 = arith.constant dense<0.000000e+00> : vector<8xf32>
    %93 = vector.multi_reduction <add>, %92, %cst_56 [1] : vector<8x128xf32> to vector<8xf32>
    %94 = vector.shape_cast %93 : vector<8xf32> to vector<8x1xf32>
    %95 = math.log %94 : vector<8x1xf32>
    %96 = arith.addf %89, %95 : vector<8x1xf32>
    %cst_57 = arith.constant -1.000000e+00 : f32
    %97 = vector.broadcast %cst_57 : f32 to vector<8x1xf32>
    %98 = arith.mulf %97, %96 : vector<8x1xf32>
    %99 = arith.cmpf ogt, %98, %61 : vector<8x1xf32>
    %100 = arith.select %99, %98, %61 : vector<8x1xi1>, vector<8x1xf32>
    %cst_58 = arith.constant 2.000000e-01 : f32
    %101 = vector.broadcast %cst_58 : f32 to vector<8x1xf32>
    %102 = arith.select %99, %101, %62 : vector<8x1xi1>, vector<8x1xf32>
    %c0_59 = arith.constant 0 : index
    %c0_60 = arith.constant 0 : index
    %103 = vector.load %arg9[%c0_59, %c0_60] : memref<8x128xf32, #tpu.memory_space<vmem>>, vector<8x128xf32>
    %cst_61 = arith.constant 0.266666681 : f32
    %104 = vector.broadcast %cst_61 : f32 to vector<8x128xf32>
    %105 = arith.mulf %104, %103 : vector<8x128xf32>
    %c0_62 = arith.constant 0 : index
    %c0_63 = arith.constant 0 : index
    %106 = vector.load %arg10[%c0_62, %c0_63] : memref<8x128xf32, #tpu.memory_space<vmem>>, vector<8x128xf32>
    %cst_64 = arith.constant 0.733333349 : f32
    %107 = vector.broadcast %cst_64 : f32 to vector<8x128xf32>
    %108 = arith.mulf %107, %106 : vector<8x128xf32>
    %109 = arith.addf %105, %108 : vector<8x128xf32>
    %c0_65 = arith.constant 0 : index
    %c0_66 = arith.constant 0 : index
    %110 = vector.load %arg5[%c0_65, %c0_66] : memref<1x128xf32, #tpu.memory_space<vmem>>, vector<1x128xf32>
    %111 = vector.broadcast %110 : vector<1x128xf32> to vector<8x128xf32>
    %112 = arith.addf %109, %111 : vector<8x128xf32>
    %cst_67 = arith.constant 0.000000e+00 : f32
    %113 = vector.broadcast %cst_67 : f32 to vector<8x128xf32>
    %114 = arith.maximumf %112, %113 : vector<8x128xf32>
    %c0_68 = arith.constant 0 : index
    %c0_69 = arith.constant 0 : index
    %115 = vector.load %arg6[%c0_68, %c0_69] : memref<128x128xf32, #tpu.memory_space<vmem>>, vector<128x128xf32>
    %cst_70 = arith.constant dense<0.000000e+00> : vector<8x128xf32>
    %116 = tpu.matmul %114, %115, %cst_70 {dimension_numbers = #tpu.dot_dimension_numbers<[1], [0], [0], [1], [0, 0, 1, 1], [], []>} : vector<8x128xf32>, vector<128x128xf32>, vector<8x128xf32> -> vector<8x128xf32>
    %c0_71 = arith.constant 0 : index
    %c0_72 = arith.constant 0 : index
    %117 = vector.load %arg7[%c0_71, %c0_72] : memref<1x128xf32, #tpu.memory_space<vmem>>, vector<1x128xf32>
    %118 = vector.broadcast %117 : vector<1x128xf32> to vector<8x128xf32>
    %119 = arith.addf %116, %118 : vector<8x128xf32>
    %cst_73 = arith.constant -1.000000e+01 : f32
    %cst_74 = arith.constant 1.000000e+01 : f32
    %120 = vector.broadcast %cst_73 : f32 to vector<8x128xf32>
    %121 = arith.maximumf %120, %119 : vector<8x128xf32>
    %122 = vector.broadcast %cst_74 : f32 to vector<8x128xf32>
    %123 = arith.minimumf %122, %121 : vector<8x128xf32>
    %cst_75 = arith.constant 1.000000e+00 : f32
    %124 = vector.broadcast %cst_75 : f32 to vector<8x128xf32>
    %125 = arith.divf %123, %124 : vector<8x128xf32>
    %cst_76 = arith.constant -1.000000e+30 : f32
    %126 = vector.broadcast %cst_76 : f32 to vector<8x128xf32>
    %127 = arith.select %10, %125, %126 : vector<8x128xi1>, vector<8x128xf32>
    %cst_77 = arith.constant dense<0xFF800000> : vector<8xf32>
    %128 = vector.multi_reduction <maximumf>, %127, %cst_77 [1] : vector<8x128xf32> to vector<8xf32>
    %129 = vector.shape_cast %128 : vector<8xf32> to vector<8x1xf32>
    %130 = vector.broadcast %129 : vector<8x1xf32> to vector<8x128xf32>
    %131 = arith.subf %127, %130 : vector<8x128xf32>
    %132 = math.exp %131 : vector<8x128xf32>
    %cst_78 = arith.constant dense<0.000000e+00> : vector<8xf32>
    %133 = vector.multi_reduction <add>, %132, %cst_78 [1] : vector<8x128xf32> to vector<8xf32>
    %134 = vector.shape_cast %133 : vector<8xf32> to vector<8x1xf32>
    %135 = math.log %134 : vector<8x1xf32>
    %136 = arith.addf %129, %135 : vector<8x1xf32>
    %cst_79 = arith.constant -1.000000e+00 : f32
    %137 = vector.broadcast %cst_79 : f32 to vector<8x1xf32>
    %138 = arith.mulf %137, %136 : vector<8x1xf32>
    %139 = arith.cmpf ogt, %138, %100 : vector<8x1xf32>
    %140 = arith.select %139, %138, %100 : vector<8x1xi1>, vector<8x1xf32>
    %cst_80 = arith.constant 0.266666681 : f32
    %141 = vector.broadcast %cst_80 : f32 to vector<8x1xf32>
    %142 = arith.select %139, %141, %102 : vector<8x1xi1>, vector<8x1xf32>
    %c0_81 = arith.constant 0 : index
    %c0_82 = arith.constant 0 : index
    %143 = vector.load %arg9[%c0_81, %c0_82] : memref<8x128xf32, #tpu.memory_space<vmem>>, vector<8x128xf32>
    %cst_83 = arith.constant 0.333333343 : f32
    %144 = vector.broadcast %cst_83 : f32 to vector<8x128xf32>
    %145 = arith.mulf %144, %143 : vector<8x128xf32>
    %c0_84 = arith.constant 0 : index
    %c0_85 = arith.constant 0 : index
    %146 = vector.load %arg10[%c0_84, %c0_85] : memref<8x128xf32, #tpu.memory_space<vmem>>, vector<8x128xf32>
    %cst_86 = arith.constant 0.666666686 : f32
    %147 = vector.broadcast %cst_86 : f32 to vector<8x128xf32>
    %148 = arith.mulf %147, %146 : vector<8x128xf32>
    %149 = arith.addf %145, %148 : vector<8x128xf32>
    %c0_87 = arith.constant 0 : index
    %c0_88 = arith.constant 0 : index
    %150 = vector.load %arg5[%c0_87, %c0_88] : memref<1x128xf32, #tpu.memory_space<vmem>>, vector<1x128xf32>
    %151 = vector.broadcast %150 : vector<1x128xf32> to vector<8x128xf32>
    %152 = arith.addf %149, %151 : vector<8x128xf32>
    %cst_89 = arith.constant 0.000000e+00 : f32
    %153 = vector.broadcast %cst_89 : f32 to vector<8x128xf32>
    %154 = arith.maximumf %152, %153 : vector<8x128xf32>
    %c0_90 = arith.constant 0 : index
    %c0_91 = arith.constant 0 : index
    %155 = vector.load %arg6[%c0_90, %c0_91] : memref<128x128xf32, #tpu.memory_space<vmem>>, vector<128x128xf32>
    %cst_92 = arith.constant dense<0.000000e+00> : vector<8x128xf32>
    %156 = tpu.matmul %154, %155, %cst_92 {dimension_numbers = #tpu.dot_dimension_numbers<[1], [0], [0], [1], [0, 0, 1, 1], [], []>} : vector<8x128xf32>, vector<128x128xf32>, vector<8x128xf32> -> vector<8x128xf32>
    %c0_93 = arith.constant 0 : index
    %c0_94 = arith.constant 0 : index
    %157 = vector.load %arg7[%c0_93, %c0_94] : memref<1x128xf32, #tpu.memory_space<vmem>>, vector<1x128xf32>
    %158 = vector.broadcast %157 : vector<1x128xf32> to vector<8x128xf32>
    %159 = arith.addf %156, %158 : vector<8x128xf32>
    %cst_95 = arith.constant -1.000000e+01 : f32
    %cst_96 = arith.constant 1.000000e+01 : f32
    %160 = vector.broadcast %cst_95 : f32 to vector<8x128xf32>
    %161 = arith.maximumf %160, %159 : vector<8x128xf32>
    %162 = vector.broadcast %cst_96 : f32 to vector<8x128xf32>
    %163 = arith.minimumf %162, %161 : vector<8x128xf32>
    %cst_97 = arith.constant 1.000000e+00 : f32
    %164 = vector.broadcast %cst_97 : f32 to vector<8x128xf32>
    %165 = arith.divf %163, %164 : vector<8x128xf32>
    %cst_98 = arith.constant -1.000000e+30 : f32
    %166 = vector.broadcast %cst_98 : f32 to vector<8x128xf32>
    %167 = arith.select %10, %165, %166 : vector<8x128xi1>, vector<8x128xf32>
    %cst_99 = arith.constant dense<0xFF800000> : vector<8xf32>
    %168 = vector.multi_reduction <maximumf>, %167, %cst_99 [1] : vector<8x128xf32> to vector<8xf32>
    %169 = vector.shape_cast %168 : vector<8xf32> to vector<8x1xf32>
    %170 = vector.broadcast %169 : vector<8x1xf32> to vector<8x128xf32>
    %171 = arith.subf %167, %170 : vector<8x128xf32>
    %172 = math.exp %171 : vector<8x128xf32>
    %cst_100 = arith.constant dense<0.000000e+00> : vector<8xf32>
    %173 = vector.multi_reduction <add>, %172, %cst_100 [1] : vector<8x128xf32> to vector<8xf32>
    %174 = vector.shape_cast %173 : vector<8xf32> to vector<8x1xf32>
    %175 = math.log %174 : vector<8x1xf32>
    %176 = arith.addf %169, %175 : vector<8x1xf32>
    %cst_101 = arith.constant -1.000000e+00 : f32
    %177 = vector.broadcast %cst_101 : f32 to vector<8x1xf32>
    %178 = arith.mulf %177, %176 : vector<8x1xf32>
    %179 = arith.cmpf ogt, %178, %140 : vector<8x1xf32>
    %180 = arith.select %179, %178, %140 : vector<8x1xi1>, vector<8x1xf32>
    %cst_102 = arith.constant 0.333333343 : f32
    %181 = vector.broadcast %cst_102 : f32 to vector<8x1xf32>
    %182 = arith.select %179, %181, %142 : vector<8x1xi1>, vector<8x1xf32>
    %c0_103 = arith.constant 0 : index
    %c0_104 = arith.constant 0 : index
    %183 = vector.load %arg9[%c0_103, %c0_104] : memref<8x128xf32, #tpu.memory_space<vmem>>, vector<8x128xf32>
    %cst_105 = arith.constant 4.000000e-01 : f32
    %184 = vector.broadcast %cst_105 : f32 to vector<8x128xf32>
    %185 = arith.mulf %184, %183 : vector<8x128xf32>
    %c0_106 = arith.constant 0 : index
    %c0_107 = arith.constant 0 : index
    %186 = vector.load %arg10[%c0_106, %c0_107] : memref<8x128xf32, #tpu.memory_space<vmem>>, vector<8x128xf32>
    %cst_108 = arith.constant 6.000000e-01 : f32
    %187 = vector.broadcast %cst_108 : f32 to vector<8x128xf32>
    %188 = arith.mulf %187, %186 : vector<8x128xf32>
    %189 = arith.addf %185, %188 : vector<8x128xf32>
    %c0_109 = arith.constant 0 : index
    %c0_110 = arith.constant 0 : index
    %190 = vector.load %arg5[%c0_109, %c0_110] : memref<1x128xf32, #tpu.memory_space<vmem>>, vector<1x128xf32>
    %191 = vector.broadcast %190 : vector<1x128xf32> to vector<8x128xf32>
    %192 = arith.addf %189, %191 : vector<8x128xf32>
    %cst_111 = arith.constant 0.000000e+00 : f32
    %193 = vector.broadcast %cst_111 : f32 to vector<8x128xf32>
    %194 = arith.maximumf %192, %193 : vector<8x128xf32>
    %c0_112 = arith.constant 0 : index
    %c0_113 = arith.constant 0 : index
    %195 = vector.load %arg6[%c0_112, %c0_113] : memref<128x128xf32, #tpu.memory_space<vmem>>, vector<128x128xf32>
    %cst_114 = arith.constant dense<0.000000e+00> : vector<8x128xf32>
    %196 = tpu.matmul %194, %195, %cst_114 {dimension_numbers = #tpu.dot_dimension_numbers<[1], [0], [0], [1], [0, 0, 1, 1], [], []>} : vector<8x128xf32>, vector<128x128xf32>, vector<8x128xf32> -> vector<8x128xf32>
    %c0_115 = arith.constant 0 : index
    %c0_116 = arith.constant 0 : index
    %197 = vector.load %arg7[%c0_115, %c0_116] : memref<1x128xf32, #tpu.memory_space<vmem>>, vector<1x128xf32>
    %198 = vector.broadcast %197 : vector<1x128xf32> to vector<8x128xf32>
    %199 = arith.addf %196, %198 : vector<8x128xf32>
    %cst_117 = arith.constant -1.000000e+01 : f32
    %cst_118 = arith.constant 1.000000e+01 : f32
    %200 = vector.broadcast %cst_117 : f32 to vector<8x128xf32>
    %201 = arith.maximumf %200, %199 : vector<8x128xf32>
    %202 = vector.broadcast %cst_118 : f32 to vector<8x128xf32>
    %203 = arith.minimumf %202, %201 : vector<8x128xf32>
    %cst_119 = arith.constant 1.000000e+00 : f32
    %204 = vector.broadcast %cst_119 : f32 to vector<8x128xf32>
    %205 = arith.divf %203, %204 : vector<8x128xf32>
    %cst_120 = arith.constant -1.000000e+30 : f32
    %206 = vector.broadcast %cst_120 : f32 to vector<8x128xf32>
    %207 = arith.select %10, %205, %206 : vector<8x128xi1>, vector<8x128xf32>
    %cst_121 = arith.constant dense<0xFF800000> : vector<8xf32>
    %208 = vector.multi_reduction <maximumf>, %207, %cst_121 [1] : vector<8x128xf32> to vector<8xf32>
    %209 = vector.shape_cast %208 : vector<8xf32> to vector<8x1xf32>
    %210 = vector.broadcast %209 : vector<8x1xf32> to vector<8x128xf32>
    %211 = arith.subf %207, %210 : vector<8x128xf32>
    %212 = math.exp %211 : vector<8x128xf32>
    %cst_122 = arith.constant dense<0.000000e+00> : vector<8xf32>
    %213 = vector.multi_reduction <add>, %212, %cst_122 [1] : vector<8x128xf32> to vector<8xf32>
    %214 = vector.shape_cast %213 : vector<8xf32> to vector<8x1xf32>
    %215 = math.log %214 : vector<8x1xf32>
    %216 = arith.addf %209, %215 : vector<8x1xf32>
    %cst_123 = arith.constant -1.000000e+00 : f32
    %217 = vector.broadcast %cst_123 : f32 to vector<8x1xf32>
    %218 = arith.mulf %217, %216 : vector<8x1xf32>
    %219 = arith.cmpf ogt, %218, %180 : vector<8x1xf32>
    %220 = arith.select %219, %218, %180 : vector<8x1xi1>, vector<8x1xf32>
    %cst_124 = arith.constant 4.000000e-01 : f32
    %221 = vector.broadcast %cst_124 : f32 to vector<8x1xf32>
    %222 = arith.select %219, %221, %182 : vector<8x1xi1>, vector<8x1xf32>
    %c0_125 = arith.constant 0 : index
    %c0_126 = arith.constant 0 : index
    %223 = vector.load %arg9[%c0_125, %c0_126] : memref<8x128xf32, #tpu.memory_space<vmem>>, vector<8x128xf32>
    %cst_127 = arith.constant 0.466666669 : f32
    %224 = vector.broadcast %cst_127 : f32 to vector<8x128xf32>
    %225 = arith.mulf %224, %223 : vector<8x128xf32>
    %c0_128 = arith.constant 0 : index
    %c0_129 = arith.constant 0 : index
    %226 = vector.load %arg10[%c0_128, %c0_129] : memref<8x128xf32, #tpu.memory_space<vmem>>, vector<8x128xf32>
    %cst_130 = arith.constant 0.533333361 : f32
    %227 = vector.broadcast %cst_130 : f32 to vector<8x128xf32>
    %228 = arith.mulf %227, %226 : vector<8x128xf32>
    %229 = arith.addf %225, %228 : vector<8x128xf32>
    %c0_131 = arith.constant 0 : index
    %c0_132 = arith.constant 0 : index
    %230 = vector.load %arg5[%c0_131, %c0_132] : memref<1x128xf32, #tpu.memory_space<vmem>>, vector<1x128xf32>
    %231 = vector.broadcast %230 : vector<1x128xf32> to vector<8x128xf32>
    %232 = arith.addf %229, %231 : vector<8x128xf32>
    %cst_133 = arith.constant 0.000000e+00 : f32
    %233 = vector.broadcast %cst_133 : f32 to vector<8x128xf32>
    %234 = arith.maximumf %232, %233 : vector<8x128xf32>
    %c0_134 = arith.constant 0 : index
    %c0_135 = arith.constant 0 : index
    %235 = vector.load %arg6[%c0_134, %c0_135] : memref<128x128xf32, #tpu.memory_space<vmem>>, vector<128x128xf32>
    %cst_136 = arith.constant dense<0.000000e+00> : vector<8x128xf32>
    %236 = tpu.matmul %234, %235, %cst_136 {dimension_numbers = #tpu.dot_dimension_numbers<[1], [0], [0], [1], [0, 0, 1, 1], [], []>} : vector<8x128xf32>, vector<128x128xf32>, vector<8x128xf32> -> vector<8x128xf32>
    %c0_137 = arith.constant 0 : index
    %c0_138 = arith.constant 0 : index
    %237 = vector.load %arg7[%c0_137, %c0_138] : memref<1x128xf32, #tpu.memory_space<vmem>>, vector<1x128xf32>
    %238 = vector.broadcast %237 : vector<1x128xf32> to vector<8x128xf32>
    %239 = arith.addf %236, %238 : vector<8x128xf32>
    %cst_139 = arith.constant -1.000000e+01 : f32
    %cst_140 = arith.constant 1.000000e+01 : f32
    %240 = vector.broadcast %cst_139 : f32 to vector<8x128xf32>
    %241 = arith.maximumf %240, %239 : vector<8x128xf32>
    %242 = vector.broadcast %cst_140 : f32 to vector<8x128xf32>
    %243 = arith.minimumf %242, %241 : vector<8x128xf32>
    %cst_141 = arith.constant 1.000000e+00 : f32
    %244 = vector.broadcast %cst_141 : f32 to vector<8x128xf32>
    %245 = arith.divf %243, %244 : vector<8x128xf32>
    %cst_142 = arith.constant -1.000000e+30 : f32
    %246 = vector.broadcast %cst_142 : f32 to vector<8x128xf32>
    %247 = arith.select %10, %245, %246 : vector<8x128xi1>, vector<8x128xf32>
    %cst_143 = arith.constant dense<0xFF800000> : vector<8xf32>
    %248 = vector.multi_reduction <maximumf>, %247, %cst_143 [1] : vector<8x128xf32> to vector<8xf32>
    %249 = vector.shape_cast %248 : vector<8xf32> to vector<8x1xf32>
    %250 = vector.broadcast %249 : vector<8x1xf32> to vector<8x128xf32>
    %251 = arith.subf %247, %250 : vector<8x128xf32>
    %252 = math.exp %251 : vector<8x128xf32>
    %cst_144 = arith.constant dense<0.000000e+00> : vector<8xf32>
    %253 = vector.multi_reduction <add>, %252, %cst_144 [1] : vector<8x128xf32> to vector<8xf32>
    %254 = vector.shape_cast %253 : vector<8xf32> to vector<8x1xf32>
    %255 = math.log %254 : vector<8x1xf32>
    %256 = arith.addf %249, %255 : vector<8x1xf32>
    %cst_145 = arith.constant -1.000000e+00 : f32
    %257 = vector.broadcast %cst_145 : f32 to vector<8x1xf32>
    %258 = arith.mulf %257, %256 : vector<8x1xf32>
    %259 = arith.cmpf ogt, %258, %220 : vector<8x1xf32>
    %260 = arith.select %259, %258, %220 : vector<8x1xi1>, vector<8x1xf32>
    %cst_146 = arith.constant 0.466666669 : f32
    %261 = vector.broadcast %cst_146 : f32 to vector<8x1xf32>
    %262 = arith.select %259, %261, %222 : vector<8x1xi1>, vector<8x1xf32>
    %c0_147 = arith.constant 0 : index
    %c0_148 = arith.constant 0 : index
    %263 = vector.load %arg9[%c0_147, %c0_148] : memref<8x128xf32, #tpu.memory_space<vmem>>, vector<8x128xf32>
    %cst_149 = arith.constant 0.533333361 : f32
    %264 = vector.broadcast %cst_149 : f32 to vector<8x128xf32>
    %265 = arith.mulf %264, %263 : vector<8x128xf32>
    %c0_150 = arith.constant 0 : index
    %c0_151 = arith.constant 0 : index
    %266 = vector.load %arg10[%c0_150, %c0_151] : memref<8x128xf32, #tpu.memory_space<vmem>>, vector<8x128xf32>
    %cst_152 = arith.constant 0.466666669 : f32
    %267 = vector.broadcast %cst_152 : f32 to vector<8x128xf32>
    %268 = arith.mulf %267, %266 : vector<8x128xf32>
    %269 = arith.addf %265, %268 : vector<8x128xf32>
    %c0_153 = arith.constant 0 : index
    %c0_154 = arith.constant 0 : index
    %270 = vector.load %arg5[%c0_153, %c0_154] : memref<1x128xf32, #tpu.memory_space<vmem>>, vector<1x128xf32>
    %271 = vector.broadcast %270 : vector<1x128xf32> to vector<8x128xf32>
    %272 = arith.addf %269, %271 : vector<8x128xf32>
    %cst_155 = arith.constant 0.000000e+00 : f32
    %273 = vector.broadcast %cst_155 : f32 to vector<8x128xf32>
    %274 = arith.maximumf %272, %273 : vector<8x128xf32>
    %c0_156 = arith.constant 0 : index
    %c0_157 = arith.constant 0 : index
    %275 = vector.load %arg6[%c0_156, %c0_157] : memref<128x128xf32, #tpu.memory_space<vmem>>, vector<128x128xf32>
    %cst_158 = arith.constant dense<0.000000e+00> : vector<8x128xf32>
    %276 = tpu.matmul %274, %275, %cst_158 {dimension_numbers = #tpu.dot_dimension_numbers<[1], [0], [0], [1], [0, 0, 1, 1], [], []>} : vector<8x128xf32>, vector<128x128xf32>, vector<8x128xf32> -> vector<8x128xf32>
    %c0_159 = arith.constant 0 : index
    %c0_160 = arith.constant 0 : index
    %277 = vector.load %arg7[%c0_159, %c0_160] : memref<1x128xf32, #tpu.memory_space<vmem>>, vector<1x128xf32>
    %278 = vector.broadcast %277 : vector<1x128xf32> to vector<8x128xf32>
    %279 = arith.addf %276, %278 : vector<8x128xf32>
    %cst_161 = arith.constant -1.000000e+01 : f32
    %cst_162 = arith.constant 1.000000e+01 : f32
    %280 = vector.broadcast %cst_161 : f32 to vector<8x128xf32>
    %281 = arith.maximumf %280, %279 : vector<8x128xf32>
    %282 = vector.broadcast %cst_162 : f32 to vector<8x128xf32>
    %283 = arith.minimumf %282, %281 : vector<8x128xf32>
    %cst_163 = arith.constant 1.000000e+00 : f32
    %284 = vector.broadcast %cst_163 : f32 to vector<8x128xf32>
    %285 = arith.divf %283, %284 : vector<8x128xf32>
    %cst_164 = arith.constant -1.000000e+30 : f32
    %286 = vector.broadcast %cst_164 : f32 to vector<8x128xf32>
    %287 = arith.select %10, %285, %286 : vector<8x128xi1>, vector<8x128xf32>
    %cst_165 = arith.constant dense<0xFF800000> : vector<8xf32>
    %288 = vector.multi_reduction <maximumf>, %287, %cst_165 [1] : vector<8x128xf32> to vector<8xf32>
    %289 = vector.shape_cast %288 : vector<8xf32> to vector<8x1xf32>
    %290 = vector.broadcast %289 : vector<8x1xf32> to vector<8x128xf32>
    %291 = arith.subf %287, %290 : vector<8x128xf32>
    %292 = math.exp %291 : vector<8x128xf32>
    %cst_166 = arith.constant dense<0.000000e+00> : vector<8xf32>
    %293 = vector.multi_reduction <add>, %292, %cst_166 [1] : vector<8x128xf32> to vector<8xf32>
    %294 = vector.shape_cast %293 : vector<8xf32> to vector<8x1xf32>
    %295 = math.log %294 : vector<8x1xf32>
    %296 = arith.addf %289, %295 : vector<8x1xf32>
    %cst_167 = arith.constant -1.000000e+00 : f32
    %297 = vector.broadcast %cst_167 : f32 to vector<8x1xf32>
    %298 = arith.mulf %297, %296 : vector<8x1xf32>
    %299 = arith.cmpf ogt, %298, %260 : vector<8x1xf32>
    %300 = arith.select %299, %298, %260 : vector<8x1xi1>, vector<8x1xf32>
    %cst_168 = arith.constant 0.533333361 : f32
    %301 = vector.broadcast %cst_168 : f32 to vector<8x1xf32>
    %302 = arith.select %299, %301, %262 : vector<8x1xi1>, vector<8x1xf32>
    %c0_169 = arith.constant 0 : index
    %c0_170 = arith.constant 0 : index
    %303 = vector.load %arg9[%c0_169, %c0_170] : memref<8x128xf32, #tpu.memory_space<vmem>>, vector<8x128xf32>
    %cst_171 = arith.constant 6.000000e-01 : f32
    %304 = vector.broadcast %cst_171 : f32 to vector<8x128xf32>
    %305 = arith.mulf %304, %303 : vector<8x128xf32>
    %c0_172 = arith.constant 0 : index
    %c0_173 = arith.constant 0 : index
    %306 = vector.load %arg10[%c0_172, %c0_173] : memref<8x128xf32, #tpu.memory_space<vmem>>, vector<8x128xf32>
    %cst_174 = arith.constant 4.000000e-01 : f32
    %307 = vector.broadcast %cst_174 : f32 to vector<8x128xf32>
    %308 = arith.mulf %307, %306 : vector<8x128xf32>
    %309 = arith.addf %305, %308 : vector<8x128xf32>
    %c0_175 = arith.constant 0 : index
    %c0_176 = arith.constant 0 : index
    %310 = vector.load %arg5[%c0_175, %c0_176] : memref<1x128xf32, #tpu.memory_space<vmem>>, vector<1x128xf32>
    %311 = vector.broadcast %310 : vector<1x128xf32> to vector<8x128xf32>
    %312 = arith.addf %309, %311 : vector<8x128xf32>
    %cst_177 = arith.constant 0.000000e+00 : f32
    %313 = vector.broadcast %cst_177 : f32 to vector<8x128xf32>
    %314 = arith.maximumf %312, %313 : vector<8x128xf32>
    %c0_178 = arith.constant 0 : index
    %c0_179 = arith.constant 0 : index
    %315 = vector.load %arg6[%c0_178, %c0_179] : memref<128x128xf32, #tpu.memory_space<vmem>>, vector<128x128xf32>
    %cst_180 = arith.constant dense<0.000000e+00> : vector<8x128xf32>
    %316 = tpu.matmul %314, %315, %cst_180 {dimension_numbers = #tpu.dot_dimension_numbers<[1], [0], [0], [1], [0, 0, 1, 1], [], []>} : vector<8x128xf32>, vector<128x128xf32>, vector<8x128xf32> -> vector<8x128xf32>
    %c0_181 = arith.constant 0 : index
    %c0_182 = arith.constant 0 : index
    %317 = vector.load %arg7[%c0_181, %c0_182] : memref<1x128xf32, #tpu.memory_space<vmem>>, vector<1x128xf32>
    %318 = vector.broadcast %317 : vector<1x128xf32> to vector<8x128xf32>
    %319 = arith.addf %316, %318 : vector<8x128xf32>
    %cst_183 = arith.constant -1.000000e+01 : f32
    %cst_184 = arith.constant 1.000000e+01 : f32
    %320 = vector.broadcast %cst_183 : f32 to vector<8x128xf32>
    %321 = arith.maximumf %320, %319 : vector<8x128xf32>
    %322 = vector.broadcast %cst_184 : f32 to vector<8x128xf32>
    %323 = arith.minimumf %322, %321 : vector<8x128xf32>
    %cst_185 = arith.constant 1.000000e+00 : f32
    %324 = vector.broadcast %cst_185 : f32 to vector<8x128xf32>
    %325 = arith.divf %323, %324 : vector<8x128xf32>
    %cst_186 = arith.constant -1.000000e+30 : f32
    %326 = vector.broadcast %cst_186 : f32 to vector<8x128xf32>
    %327 = arith.select %10, %325, %326 : vector<8x128xi1>, vector<8x128xf32>
    %cst_187 = arith.constant dense<0xFF800000> : vector<8xf32>
    %328 = vector.multi_reduction <maximumf>, %327, %cst_187 [1] : vector<8x128xf32> to vector<8xf32>
    %329 = vector.shape_cast %328 : vector<8xf32> to vector<8x1xf32>
    %330 = vector.broadcast %329 : vector<8x1xf32> to vector<8x128xf32>
    %331 = arith.subf %327, %330 : vector<8x128xf32>
    %332 = math.exp %331 : vector<8x128xf32>
    %cst_188 = arith.constant dense<0.000000e+00> : vector<8xf32>
    %333 = vector.multi_reduction <add>, %332, %cst_188 [1] : vector<8x128xf32> to vector<8xf32>
    %334 = vector.shape_cast %333 : vector<8xf32> to vector<8x1xf32>
    %335 = math.log %334 : vector<8x1xf32>
    %336 = arith.addf %329, %335 : vector<8x1xf32>
    %cst_189 = arith.constant -1.000000e+00 : f32
    %337 = vector.broadcast %cst_189 : f32 to vector<8x1xf32>
    %338 = arith.mulf %337, %336 : vector<8x1xf32>
    %339 = arith.cmpf ogt, %338, %300 : vector<8x1xf32>
    %340 = arith.select %339, %338, %300 : vector<8x1xi1>, vector<8x1xf32>
    %cst_190 = arith.constant 6.000000e-01 : f32
    %341 = vector.broadcast %cst_190 : f32 to vector<8x1xf32>
    %342 = arith.select %339, %341, %302 : vector<8x1xi1>, vector<8x1xf32>
    %c0_191 = arith.constant 0 : index
    %c0_192 = arith.constant 0 : index
    %343 = vector.load %arg9[%c0_191, %c0_192] : memref<8x128xf32, #tpu.memory_space<vmem>>, vector<8x128xf32>
    %cst_193 = arith.constant 0.666666686 : f32
    %344 = vector.broadcast %cst_193 : f32 to vector<8x128xf32>
    %345 = arith.mulf %344, %343 : vector<8x128xf32>
    %c0_194 = arith.constant 0 : index
    %c0_195 = arith.constant 0 : index
    %346 = vector.load %arg10[%c0_194, %c0_195] : memref<8x128xf32, #tpu.memory_space<vmem>>, vector<8x128xf32>
    %cst_196 = arith.constant 0.333333343 : f32
    %347 = vector.broadcast %cst_196 : f32 to vector<8x128xf32>
    %348 = arith.mulf %347, %346 : vector<8x128xf32>
    %349 = arith.addf %345, %348 : vector<8x128xf32>
    %c0_197 = arith.constant 0 : index
    %c0_198 = arith.constant 0 : index
    %350 = vector.load %arg5[%c0_197, %c0_198] : memref<1x128xf32, #tpu.memory_space<vmem>>, vector<1x128xf32>
    %351 = vector.broadcast %350 : vector<1x128xf32> to vector<8x128xf32>
    %352 = arith.addf %349, %351 : vector<8x128xf32>
    %cst_199 = arith.constant 0.000000e+00 : f32
    %353 = vector.broadcast %cst_199 : f32 to vector<8x128xf32>
    %354 = arith.maximumf %352, %353 : vector<8x128xf32>
    %c0_200 = arith.constant 0 : index
    %c0_201 = arith.constant 0 : index
    %355 = vector.load %arg6[%c0_200, %c0_201] : memref<128x128xf32, #tpu.memory_space<vmem>>, vector<128x128xf32>
    %cst_202 = arith.constant dense<0.000000e+00> : vector<8x128xf32>
    %356 = tpu.matmul %354, %355, %cst_202 {dimension_numbers = #tpu.dot_dimension_numbers<[1], [0], [0], [1], [0, 0, 1, 1], [], []>} : vector<8x128xf32>, vector<128x128xf32>, vector<8x128xf32> -> vector<8x128xf32>
    %c0_203 = arith.constant 0 : index
    %c0_204 = arith.constant 0 : index
    %357 = vector.load %arg7[%c0_203, %c0_204] : memref<1x128xf32, #tpu.memory_space<vmem>>, vector<1x128xf32>
    %358 = vector.broadcast %357 : vector<1x128xf32> to vector<8x128xf32>
    %359 = arith.addf %356, %358 : vector<8x128xf32>
    %cst_205 = arith.constant -1.000000e+01 : f32
    %cst_206 = arith.constant 1.000000e+01 : f32
    %360 = vector.broadcast %cst_205 : f32 to vector<8x128xf32>
    %361 = arith.maximumf %360, %359 : vector<8x128xf32>
    %362 = vector.broadcast %cst_206 : f32 to vector<8x128xf32>
    %363 = arith.minimumf %362, %361 : vector<8x128xf32>
    %cst_207 = arith.constant 1.000000e+00 : f32
    %364 = vector.broadcast %cst_207 : f32 to vector<8x128xf32>
    %365 = arith.divf %363, %364 : vector<8x128xf32>
    %cst_208 = arith.constant -1.000000e+30 : f32
    %366 = vector.broadcast %cst_208 : f32 to vector<8x128xf32>
    %367 = arith.select %10, %365, %366 : vector<8x128xi1>, vector<8x128xf32>
    %cst_209 = arith.constant dense<0xFF800000> : vector<8xf32>
    %368 = vector.multi_reduction <maximumf>, %367, %cst_209 [1] : vector<8x128xf32> to vector<8xf32>
    %369 = vector.shape_cast %368 : vector<8xf32> to vector<8x1xf32>
    %370 = vector.broadcast %369 : vector<8x1xf32> to vector<8x128xf32>
    %371 = arith.subf %367, %370 : vector<8x128xf32>
    %372 = math.exp %371 : vector<8x128xf32>
    %cst_210 = arith.constant dense<0.000000e+00> : vector<8xf32>
    %373 = vector.multi_reduction <add>, %372, %cst_210 [1] : vector<8x128xf32> to vector<8xf32>
    %374 = vector.shape_cast %373 : vector<8xf32> to vector<8x1xf32>
    %375 = math.log %374 : vector<8x1xf32>
    %376 = arith.addf %369, %375 : vector<8x1xf32>
    %cst_211 = arith.constant -1.000000e+00 : f32
    %377 = vector.broadcast %cst_211 : f32 to vector<8x1xf32>
    %378 = arith.mulf %377, %376 : vector<8x1xf32>
    %379 = arith.cmpf ogt, %378, %340 : vector<8x1xf32>
    %380 = arith.select %379, %378, %340 : vector<8x1xi1>, vector<8x1xf32>
    %cst_212 = arith.constant 0.666666686 : f32
    %381 = vector.broadcast %cst_212 : f32 to vector<8x1xf32>
    %382 = arith.select %379, %381, %342 : vector<8x1xi1>, vector<8x1xf32>
    %c0_213 = arith.constant 0 : index
    %c0_214 = arith.constant 0 : index
    %383 = vector.load %arg9[%c0_213, %c0_214] : memref<8x128xf32, #tpu.memory_space<vmem>>, vector<8x128xf32>
    %cst_215 = arith.constant 0.733333349 : f32
    %384 = vector.broadcast %cst_215 : f32 to vector<8x128xf32>
    %385 = arith.mulf %384, %383 : vector<8x128xf32>
    %c0_216 = arith.constant 0 : index
    %c0_217 = arith.constant 0 : index
    %386 = vector.load %arg10[%c0_216, %c0_217] : memref<8x128xf32, #tpu.memory_space<vmem>>, vector<8x128xf32>
    %cst_218 = arith.constant 0.266666681 : f32
    %387 = vector.broadcast %cst_218 : f32 to vector<8x128xf32>
    %388 = arith.mulf %387, %386 : vector<8x128xf32>
    %389 = arith.addf %385, %388 : vector<8x128xf32>
    %c0_219 = arith.constant 0 : index
    %c0_220 = arith.constant 0 : index
    %390 = vector.load %arg5[%c0_219, %c0_220] : memref<1x128xf32, #tpu.memory_space<vmem>>, vector<1x128xf32>
    %391 = vector.broadcast %390 : vector<1x128xf32> to vector<8x128xf32>
    %392 = arith.addf %389, %391 : vector<8x128xf32>
    %cst_221 = arith.constant 0.000000e+00 : f32
    %393 = vector.broadcast %cst_221 : f32 to vector<8x128xf32>
    %394 = arith.maximumf %392, %393 : vector<8x128xf32>
    %c0_222 = arith.constant 0 : index
    %c0_223 = arith.constant 0 : index
    %395 = vector.load %arg6[%c0_222, %c0_223] : memref<128x128xf32, #tpu.memory_space<vmem>>, vector<128x128xf32>
    %cst_224 = arith.constant dense<0.000000e+00> : vector<8x128xf32>
    %396 = tpu.matmul %394, %395, %cst_224 {dimension_numbers = #tpu.dot_dimension_numbers<[1], [0], [0], [1], [0, 0, 1, 1], [], []>} : vector<8x128xf32>, vector<128x128xf32>, vector<8x128xf32> -> vector<8x128xf32>
    %c0_225 = arith.constant 0 : index
    %c0_226 = arith.constant 0 : index
    %397 = vector.load %arg7[%c0_225, %c0_226] : memref<1x128xf32, #tpu.memory_space<vmem>>, vector<1x128xf32>
    %398 = vector.broadcast %397 : vector<1x128xf32> to vector<8x128xf32>
    %399 = arith.addf %396, %398 : vector<8x128xf32>
    %cst_227 = arith.constant -1.000000e+01 : f32
    %cst_228 = arith.constant 1.000000e+01 : f32
    %400 = vector.broadcast %cst_227 : f32 to vector<8x128xf32>
    %401 = arith.maximumf %400, %399 : vector<8x128xf32>
    %402 = vector.broadcast %cst_228 : f32 to vector<8x128xf32>
    %403 = arith.minimumf %402, %401 : vector<8x128xf32>
    %cst_229 = arith.constant 1.000000e+00 : f32
    %404 = vector.broadcast %cst_229 : f32 to vector<8x128xf32>
    %405 = arith.divf %403, %404 : vector<8x128xf32>
    %cst_230 = arith.constant -1.000000e+30 : f32
    %406 = vector.broadcast %cst_230 : f32 to vector<8x128xf32>
    %407 = arith.select %10, %405, %406 : vector<8x128xi1>, vector<8x128xf32>
    %cst_231 = arith.constant dense<0xFF800000> : vector<8xf32>
    %408 = vector.multi_reduction <maximumf>, %407, %cst_231 [1] : vector<8x128xf32> to vector<8xf32>
    %409 = vector.shape_cast %408 : vector<8xf32> to vector<8x1xf32>
    %410 = vector.broadcast %409 : vector<8x1xf32> to vector<8x128xf32>
    %411 = arith.subf %407, %410 : vector<8x128xf32>
    %412 = math.exp %411 : vector<8x128xf32>
    %cst_232 = arith.constant dense<0.000000e+00> : vector<8xf32>
    %413 = vector.multi_reduction <add>, %412, %cst_232 [1] : vector<8x128xf32> to vector<8xf32>
    %414 = vector.shape_cast %413 : vector<8xf32> to vector<8x1xf32>
    %415 = math.log %414 : vector<8x1xf32>
    %416 = arith.addf %409, %415 : vector<8x1xf32>
    %cst_233 = arith.constant -1.000000e+00 : f32
    %417 = vector.broadcast %cst_233 : f32 to vector<8x1xf32>
    %418 = arith.mulf %417, %416 : vector<8x1xf32>
    %419 = arith.cmpf ogt, %418, %380 : vector<8x1xf32>
    %420 = arith.select %419, %418, %380 : vector<8x1xi1>, vector<8x1xf32>
    %cst_234 = arith.constant 0.733333349 : f32
    %421 = vector.broadcast %cst_234 : f32 to vector<8x1xf32>
    %422 = arith.select %419, %421, %382 : vector<8x1xi1>, vector<8x1xf32>
    %c0_235 = arith.constant 0 : index
    %c0_236 = arith.constant 0 : index
    %423 = vector.load %arg9[%c0_235, %c0_236] : memref<8x128xf32, #tpu.memory_space<vmem>>, vector<8x128xf32>
    %cst_237 = arith.constant 8.000000e-01 : f32
    %424 = vector.broadcast %cst_237 : f32 to vector<8x128xf32>
    %425 = arith.mulf %424, %423 : vector<8x128xf32>
    %c0_238 = arith.constant 0 : index
    %c0_239 = arith.constant 0 : index
    %426 = vector.load %arg10[%c0_238, %c0_239] : memref<8x128xf32, #tpu.memory_space<vmem>>, vector<8x128xf32>
    %cst_240 = arith.constant 2.000000e-01 : f32
    %427 = vector.broadcast %cst_240 : f32 to vector<8x128xf32>
    %428 = arith.mulf %427, %426 : vector<8x128xf32>
    %429 = arith.addf %425, %428 : vector<8x128xf32>
    %c0_241 = arith.constant 0 : index
    %c0_242 = arith.constant 0 : index
    %430 = vector.load %arg5[%c0_241, %c0_242] : memref<1x128xf32, #tpu.memory_space<vmem>>, vector<1x128xf32>
    %431 = vector.broadcast %430 : vector<1x128xf32> to vector<8x128xf32>
    %432 = arith.addf %429, %431 : vector<8x128xf32>
    %cst_243 = arith.constant 0.000000e+00 : f32
    %433 = vector.broadcast %cst_243 : f32 to vector<8x128xf32>
    %434 = arith.maximumf %432, %433 : vector<8x128xf32>
    %c0_244 = arith.constant 0 : index
    %c0_245 = arith.constant 0 : index
    %435 = vector.load %arg6[%c0_244, %c0_245] : memref<128x128xf32, #tpu.memory_space<vmem>>, vector<128x128xf32>
    %cst_246 = arith.constant dense<0.000000e+00> : vector<8x128xf32>
    %436 = tpu.matmul %434, %435, %cst_246 {dimension_numbers = #tpu.dot_dimension_numbers<[1], [0], [0], [1], [0, 0, 1, 1], [], []>} : vector<8x128xf32>, vector<128x128xf32>, vector<8x128xf32> -> vector<8x128xf32>
    %c0_247 = arith.constant 0 : index
    %c0_248 = arith.constant 0 : index
    %437 = vector.load %arg7[%c0_247, %c0_248] : memref<1x128xf32, #tpu.memory_space<vmem>>, vector<1x128xf32>
    %438 = vector.broadcast %437 : vector<1x128xf32> to vector<8x128xf32>
    %439 = arith.addf %436, %438 : vector<8x128xf32>
    %cst_249 = arith.constant -1.000000e+01 : f32
    %cst_250 = arith.constant 1.000000e+01 : f32
    %440 = vector.broadcast %cst_249 : f32 to vector<8x128xf32>
    %441 = arith.maximumf %440, %439 : vector<8x128xf32>
    %442 = vector.broadcast %cst_250 : f32 to vector<8x128xf32>
    %443 = arith.minimumf %442, %441 : vector<8x128xf32>
    %cst_251 = arith.constant 1.000000e+00 : f32
    %444 = vector.broadcast %cst_251 : f32 to vector<8x128xf32>
    %445 = arith.divf %443, %444 : vector<8x128xf32>
    %cst_252 = arith.constant -1.000000e+30 : f32
    %446 = vector.broadcast %cst_252 : f32 to vector<8x128xf32>
    %447 = arith.select %10, %445, %446 : vector<8x128xi1>, vector<8x128xf32>
    %cst_253 = arith.constant dense<0xFF800000> : vector<8xf32>
    %448 = vector.multi_reduction <maximumf>, %447, %cst_253 [1] : vector<8x128xf32> to vector<8xf32>
    %449 = vector.shape_cast %448 : vector<8xf32> to vector<8x1xf32>
    %450 = vector.broadcast %449 : vector<8x1xf32> to vector<8x128xf32>
    %451 = arith.subf %447, %450 : vector<8x128xf32>
    %452 = math.exp %451 : vector<8x128xf32>
    %cst_254 = arith.constant dense<0.000000e+00> : vector<8xf32>
    %453 = vector.multi_reduction <add>, %452, %cst_254 [1] : vector<8x128xf32> to vector<8xf32>
    %454 = vector.shape_cast %453 : vector<8xf32> to vector<8x1xf32>
    %455 = math.log %454 : vector<8x1xf32>
    %456 = arith.addf %449, %455 : vector<8x1xf32>
    %cst_255 = arith.constant -1.000000e+00 : f32
    %457 = vector.broadcast %cst_255 : f32 to vector<8x1xf32>
    %458 = arith.mulf %457, %456 : vector<8x1xf32>
    %459 = arith.cmpf ogt, %458, %420 : vector<8x1xf32>
    %cst_256 = arith.constant 8.000000e-01 : f32
    %460 = vector.broadcast %cst_256 : f32 to vector<8x1xf32>
    %461 = arith.select %459, %460, %422 : vector<8x1xi1>, vector<8x1xf32>
    %c0_257 = arith.constant 0 : index
    %c0_258 = arith.constant 0 : index
    %462 = vector.load %arg9[%c0_257, %c0_258] : memref<8x128xf32, #tpu.memory_space<vmem>>, vector<8x128xf32>
    %c0_259 = arith.constant 0 : index
    %c0_260 = arith.constant 0 : index
    %463 = vector.load %arg5[%c0_259, %c0_260] : memref<1x128xf32, #tpu.memory_space<vmem>>, vector<1x128xf32>
    %464 = vector.broadcast %463 : vector<1x128xf32> to vector<8x128xf32>
    %465 = arith.addf %462, %464 : vector<8x128xf32>
    %cst_261 = arith.constant 0.000000e+00 : f32
    %466 = vector.broadcast %cst_261 : f32 to vector<8x128xf32>
    %467 = arith.maximumf %465, %466 : vector<8x128xf32>
    %c0_262 = arith.constant 0 : index
    %c0_263 = arith.constant 0 : index
    %468 = vector.load %arg9[%c0_262, %c0_263] : memref<8x128xf32, #tpu.memory_space<vmem>>, vector<8x128xf32>
    %469 = vector.broadcast %461 : vector<8x1xf32> to vector<8x128xf32>
    %470 = arith.mulf %469, %468 : vector<8x128xf32>
    %cst_264 = arith.constant 1.000000e+00 : f32
    %471 = vector.broadcast %cst_264 : f32 to vector<8x1xf32>
    %472 = arith.subf %471, %461 : vector<8x1xf32>
    %c0_265 = arith.constant 0 : index
    %c0_266 = arith.constant 0 : index
    %473 = vector.load %arg10[%c0_265, %c0_266] : memref<8x128xf32, #tpu.memory_space<vmem>>, vector<8x128xf32>
    %474 = vector.broadcast %472 : vector<8x1xf32> to vector<8x128xf32>
    %475 = arith.mulf %474, %473 : vector<8x128xf32>
    %476 = arith.addf %470, %475 : vector<8x128xf32>
    %c0_267 = arith.constant 0 : index
    %c0_268 = arith.constant 0 : index
    %477 = vector.load %arg5[%c0_267, %c0_268] : memref<1x128xf32, #tpu.memory_space<vmem>>, vector<1x128xf32>
    %478 = vector.broadcast %477 : vector<1x128xf32> to vector<8x128xf32>
    %479 = arith.addf %476, %478 : vector<8x128xf32>
    %cst_269 = arith.constant 0.000000e+00 : f32
    %480 = vector.broadcast %cst_269 : f32 to vector<8x128xf32>
    %481 = arith.maximumf %479, %480 : vector<8x128xf32>
    %c0_270 = arith.constant 0 : index
    %c0_271 = arith.constant 0 : index
    %482 = vector.load %arg6[%c0_270, %c0_271] : memref<128x128xf32, #tpu.memory_space<vmem>>, vector<128x128xf32>
    %cst_272 = arith.constant dense<0.000000e+00> : vector<8x128xf32>
    %483 = tpu.matmul %481, %482, %cst_272 {dimension_numbers = #tpu.dot_dimension_numbers<[1], [0], [0], [1], [0, 0, 1, 1], [], []>} : vector<8x128xf32>, vector<128x128xf32>, vector<8x128xf32> -> vector<8x128xf32>
    %c0_273 = arith.constant 0 : index
    %c0_274 = arith.constant 0 : index
    %484 = vector.load %arg7[%c0_273, %c0_274] : memref<1x128xf32, #tpu.memory_space<vmem>>, vector<1x128xf32>
    %485 = vector.broadcast %484 : vector<1x128xf32> to vector<8x128xf32>
    %486 = arith.addf %483, %485 : vector<8x128xf32>
    %cst_275 = arith.constant -1.000000e+01 : f32
    %cst_276 = arith.constant 1.000000e+01 : f32
    %487 = vector.broadcast %cst_275 : f32 to vector<8x128xf32>
    %488 = arith.maximumf %487, %486 : vector<8x128xf32>
    %489 = vector.broadcast %cst_276 : f32 to vector<8x128xf32>
    %490 = arith.minimumf %489, %488 : vector<8x128xf32>
    %cst_277 = arith.constant 1.000000e+00 : f32
    %491 = vector.broadcast %cst_277 : f32 to vector<8x128xf32>
    %492 = arith.divf %490, %491 : vector<8x128xf32>
    %cst_278 = arith.constant -1.000000e+30 : f32
    %493 = vector.broadcast %cst_278 : f32 to vector<8x128xf32>
    %494 = arith.select %10, %492, %493 : vector<8x128xi1>, vector<8x128xf32>
    %cst_279 = arith.constant dense<0xFF800000> : vector<8xf32>
    %495 = vector.multi_reduction <maximumf>, %494, %cst_279 [1] : vector<8x128xf32> to vector<8xf32>
    %496 = vector.shape_cast %495 : vector<8xf32> to vector<8x1xf32>
    %497 = vector.broadcast %496 : vector<8x1xf32> to vector<8x128xf32>
    %498 = arith.subf %494, %497 : vector<8x128xf32>
    %499 = math.exp %498 : vector<8x128xf32>
    %cst_280 = arith.constant dense<0.000000e+00> : vector<8xf32>
    %500 = vector.multi_reduction <add>, %499, %cst_280 [1] : vector<8x128xf32> to vector<8xf32>
    %501 = vector.shape_cast %500 : vector<8xf32> to vector<8x1xf32>
    %502 = math.log %501 : vector<8x1xf32>
    %503 = arith.addf %496, %502 : vector<8x1xf32>
    %cst_281 = arith.constant -1.000000e+00 : f32
    %504 = vector.broadcast %cst_281 : f32 to vector<8x1xf32>
    %505 = arith.mulf %504, %503 : vector<8x1xf32>
    %506 = arith.subf %467, %481 : vector<8x128xf32>
    %507 = arith.mulf %506, %506 : vector<8x128xf32>
    %cst_282 = arith.constant dense<0.000000e+00> : vector<8xf32>
    %508 = vector.multi_reduction <add>, %507, %cst_282 [1] : vector<8x128xf32> to vector<8xf32>
    %509 = vector.shape_cast %508 : vector<8xf32> to vector<8x1xf32>
    %510 = tpu.iota {dimensions = array<i32: 1>} : vector<8x8xi32>
    %cst_283 = arith.constant 0.000000e+00 : f32
    %511 = vector.broadcast %cst_283 : f32 to vector<8x8xf32>
    %c0_i32 = arith.constant 0 : i32
    %512 = vector.broadcast %c0_i32 : i32 to vector<8x8xi32>
    %513 = arith.cmpi eq, %510, %512 : vector<8x8xi32>
    %514 = vector.shape_cast %40 : vector<8x1xf32> to vector<8x1xf32>
    %515 = vector.broadcast %514 : vector<8x1xf32> to vector<8x8xf32>
    %516 = arith.select %513, %515, %511 : vector<8x8xi1>, vector<8x8xf32>
    %c1_i32 = arith.constant 1 : i32
    %517 = vector.broadcast %c1_i32 : i32 to vector<8x8xi32>
    %518 = arith.cmpi eq, %510, %517 : vector<8x8xi32>
    %519 = vector.shape_cast %60 : vector<8x1xf32> to vector<8x1xf32>
    %520 = vector.broadcast %519 : vector<8x1xf32> to vector<8x8xf32>
    %521 = arith.select %518, %520, %511 : vector<8x8xi1>, vector<8x8xf32>
    %522 = arith.addf %516, %521 : vector<8x8xf32>
    %c2_i32 = arith.constant 2 : i32
    %523 = vector.broadcast %c2_i32 : i32 to vector<8x8xi32>
    %524 = arith.cmpi eq, %510, %523 : vector<8x8xi32>
    %525 = vector.shape_cast %505 : vector<8x1xf32> to vector<8x1xf32>
    %526 = vector.broadcast %525 : vector<8x1xf32> to vector<8x8xf32>
    %527 = arith.select %524, %526, %511 : vector<8x8xi1>, vector<8x8xf32>
    %528 = arith.addf %522, %527 : vector<8x8xf32>
    %c3_i32 = arith.constant 3 : i32
    %529 = vector.broadcast %c3_i32 : i32 to vector<8x8xi32>
    %530 = arith.cmpi eq, %510, %529 : vector<8x8xi32>
    %531 = vector.shape_cast %509 : vector<8x1xf32> to vector<8x1xf32>
    %532 = vector.broadcast %531 : vector<8x1xf32> to vector<8x8xf32>
    %533 = arith.select %530, %532, %511 : vector<8x8xi1>, vector<8x8xf32>
    %534 = arith.addf %528, %533 : vector<8x8xf32>
    %c0_284 = arith.constant 0 : index
    %c0_285 = arith.constant 0 : index
    %535 = vector.load %arg8[%c0_284, %c0_285] : memref<8x8xf32, #tpu.memory_space<vmem>>, vector<8x8xf32>
    tpu.vector_store %arg8[%c0_284, %c0_285], %534 {strides = array<i32>} : memref<8x8xf32, #tpu.memory_space<vmem>>, vector<8x8xf32>,
    return
  }
  func.func @transform_0(%arg0: i32) -> (i32, i32) {
    %c0_i32 = arith.constant 0 : i32
    %c0_i32_0 = arith.constant 0 : i32
    return %arg0, %c0_i32 : i32, i32
  }
  func.func @transform_1(%arg0: i32) -> (i32, i32) {
    %c0_i32 = arith.constant 0 : i32
    %c0_i32_0 = arith.constant 0 : i32
    return %arg0, %c0_i32 : i32, i32
  }
  func.func @transform_2(%arg0: i32) -> (i32, i32) {
    %c0_i32 = arith.constant 0 : i32
    %c0_i32_0 = arith.constant 0 : i32
    return %arg0, %c0_i32 : i32, i32
  }
  func.func @transform_3(%arg0: i32) -> (i32, i32) {
    %c0_i32 = arith.constant 0 : i32
    %c0_i32_0 = arith.constant 0 : i32
    %c0_i32_1 = arith.constant 0 : i32
    return %c0_i32, %c0_i32_0 : i32, i32
  }
  func.func @transform_4(%arg0: i32) -> (i32, i32) {
    %c0_i32 = arith.constant 0 : i32
    %c0_i32_0 = arith.constant 0 : i32
    %c0_i32_1 = arith.constant 0 : i32
    return %c0_i32, %c0_i32_0 : i32, i32
  }
  func.func @transform_5(%arg0: i32) -> (i32, i32) {
    %c0_i32 = arith.constant 0 : i32
    %c0_i32_0 = arith.constant 0 : i32
    %c0_i32_1 = arith.constant 0 : i32
    return %c0_i32, %c0_i32_0 : i32, i32
  }
  func.func @transform_6(%arg0: i32) -> (i32, i32) {
    %c0_i32 = arith.constant 0 : i32
    %c0_i32_0 = arith.constant 0 : i32
    %c0_i32_1 = arith.constant 0 : i32
    return %c0_i32, %c0_i32_0 : i32, i32
  }
  func.func @transform_7(%arg0: i32) -> (i32, i32) {
    %c0_i32 = arith.constant 0 : i32
    %c0_i32_0 = arith.constant 0 : i32
    return %arg0, %c0_i32 : i32, i32
  }
}

</mosaic_0001>

<bundles_post_ra>
// kernel: energy_constrained_dro_forward.1
= control target key start
LH: loop header
LB: loop body
LE: loop exit
PB: predicated region body
PF: predicated region fallthrough
CT: control target
= control target key end

     0   :  { %vm3772_vm0 = vmmov 0   ;;  %s4890_s3 = inlined_call_operand.vmem [shape: bf16[1024,128], index: 3, kind: input, shape index: {}]   ;;  %s4891_s0 = inlined_call_operand.vmem [shape: bf16[8,1024], index: 0, kind: input, shape index: {}]   ;;  %s4892_s1 = inlined_call_operand.vmem [shape: bf16[8,1024], index: 1, kind: input, shape index: {}]   ;;  %s4893_s5 = inlined_call_operand.vmem [shape: f32[128,128], index: 5, kind: input, shape index: {}]   ;;  %s4894_s4 = inlined_call_operand.vmem [shape: f32[1,128], index: 4, kind: input, shape index: {}]   ;;  %s4895_s6 = inlined_call_operand.vmem [shape: f32[1,128], index: 6, kind: input, shape index: {}]   ;;  %s4896_s2 = inlined_call_operand.vmem [shape: s32[8,1], index: 2, kind: input, shape index: {}]   ;;  %s4897_s7 = inlined_call_operand.vmem [shape: f32[8,8], index: 7, kind: output, shape index: {}]  }
   0x1   :  { %v3574_v0 = vld [vmem:[%s4890_s3 + $0x78] sm:$0xff]   ;;  %v3578_v4 = vld [vmem:[%s4890_s3 + $0x70] sm:$0xff]   ;;  %v3582_v8 = vld [vmem:[%s4890_s3 + $0x68] sm:$0xff]  }
   0x2   :  { %v3575_v1 = vld [vmem:[%s4890_s3 + $0xf8] sm:$0xff]   ;;  %2769 = vmatprep.subr.bf16.mxu0 %v3574_v0  ;;  %v3579_v5 = vld [vmem:[%s4890_s3 + $0xf0] sm:$0xff]   ;;  %v3583_v9 = vld [vmem:[%s4890_s3 + $0xe8] sm:$0xff]  }
   0x3   :  { %v3576_v2 = vld [vmem:[%s4890_s3 + $0x38] sm:$0xff]   ;;  %2791 = vmatprep.subr.bf16.mxu1 %v3575_v1  ;;  %v3580_v6 = vld [vmem:[%s4890_s3 + $0x30] sm:$0xff]   ;;  %v3584_v10 = vld [vmem:[%s4890_s3 + $0x28] sm:$0xff]  }
   0x4   :  { %v3577_v3 = vld [vmem:[%s4890_s3 + $0xb8] sm:$0xff]   ;;  %2770 = vmatpush3.bf16.msra.mxu0 %v3576_v2  ;;  %v3581_v7 = vld [vmem:[%s4890_s3 + $0xb0] sm:$0xff]   ;;  %v3585_v11 = vld [vmem:[%s4890_s3 + $0xa8] sm:$0xff]  }
   0x5   :  { %2792 = vmatpush3.bf16.msra.mxu1 %v3577_v3  ;;  %2771 = vmatprep.subr.bf16.mxu0 %v3578_v4  ;;  %v3586_v12 = vld [vmem:[%s4890_s3 + $0x60] sm:$0xff]   ;;  %v3590_v16 = vld [vmem:[%s4890_s3 + $0x58] sm:$0xff]   ;;  %v3594_v20 = vld [vmem:[%s4890_s3 + $0x50] sm:$0xff]  }
   0x6   :  { %2793 = vmatprep.subr.bf16.mxu1 %v3579_v5  ;;  %v3587_v13 = vld [vmem:[%s4890_s3 + $0xe0] sm:$0xff]   ;;  %v3591_v17 = vld [vmem:[%s4890_s3 + $0xd8] sm:$0xff]   ;;  %v3595_v21 = vld [vmem:[%s4890_s3 + $0xd0] sm:$0xff]  }
   0x7   :  { %v3588_v14 = vld [vmem:[%s4890_s3 + $0x20] sm:$0xff]   ;;  %v3592_v18 = vld [vmem:[%s4890_s3 + $0x18] sm:$0xff]   ;;  %v3596_v22 = vld [vmem:[%s4890_s3 + $0x10] sm:$0xff]  }
   0x8   :  { %2772 = vmatpush3.bf16.msra.mxu0 %v3580_v6  ;;  %v3589_v15 = vld [vmem:[%s4890_s3 + $0xa0] sm:$0xff]   ;;  %v3593_v19 = vld [vmem:[%s4890_s3 + $0x98] sm:$0xff]   ;;  %v3597_v23 = vld [vmem:[%s4890_s3 + $0x90] sm:$0xff]  }
   0x9   :  { %2794 = vmatpush3.bf16.msra.mxu1 %v3581_v7  ;;  %2773 = vmatprep.subr.bf16.mxu0 %v3582_v8  ;;  %v3598_v24 = vld [vmem:[%s4890_s3 + $0x48] sm:$0xff]   ;;  %v3602_v28 = vld [vmem:[%s4890_s3 + $0x40] sm:$0xff]   ;;  %v3610_v38 = vld [vmem:[%s4890_s3 + $0x178] sm:$0xff]  }
   0xa   :  { %2795 = vmatprep.subr.bf16.mxu1 %v3583_v9  ;;  %v3599_v25 = vld [vmem:[%s4890_s3 + $0xc8] sm:$0xff]   ;;  %v3603_v29 = vld [vmem:[%s4890_s3 + $0xc0] sm:$0xff]   ;;  %v3611_v39 = vld [vmem:[%s4890_s3 + $0x1f8] sm:$0xff]  }
   0xb   :  { %v3600_v26 = vld [vmem:[%s4890_s3 + $0x8] sm:$0xff]   ;;  %v3604_v30 = vld [vmem:[%s4890_s3] sm:$0xff]   ;;  %v3612_v40 = vld [vmem:[%s4890_s3 + $0x138] sm:$0xff]  }
   0xc   :  { %2774 = vmatpush3.bf16.msra.mxu0 %v3584_v10  ;;  %v3601_v27 = vld [vmem:[%s4890_s3 + $0x88] sm:$0xff]   ;;  %v3605_v31 = vld [vmem:[%s4890_s3 + $0x80] sm:$0xff]   ;;  %v3613_v41 = vld [vmem:[%s4890_s3 + $0x1b8] sm:$0xff]  }
   0xd   :  { %2796 = vmatpush3.bf16.msra.mxu1 %v3585_v11  ;;  %2775 = vmatprep.subr.bf16.mxu0 %v3586_v12  ;;  %v27_v32 = vld [vmem:[%s4891_s0] sm:$0xff]  ;;  %v28_v33 = vld [vmem:[%s4891_s0 + $0x8] sm:$0xff]  ;;  %v3614_v42 = vld [vmem:[%s4890_s3 + $0x170] sm:$0xff]  }
   0xe   :  { %2797 = vmatprep.subr.bf16.mxu1 %v3587_v13  ;;  %v2610_v34 = vcombine.low %v27_v32, %v27_v32  ;;  %v2611_v35 = vcombine.high %v27_v32, %v27_v32  ;;  %v2612_v36 = vcombine.low %v28_v33, %v28_v33  ;;  %v2613_v37 = vcombine.high %v28_v33, %v28_v33  ;;  %v3615_v43 = vld [vmem:[%s4890_s3 + $0x1f0] sm:$0xff]   ;;  %v3618_v46 = vld [vmem:[%s4890_s3 + $0x168] sm:$0xff]   ;;  %v3622_v50 = vld [vmem:[%s4890_s3 + $0x160] sm:$0xff]  }
   0xf   :  { %v3616_v44 = vld [vmem:[%s4890_s3 + $0x130] sm:$0xff]   ;;  %v3619_v47 = vld [vmem:[%s4890_s3 + $0x1e8] sm:$0xff]   ;;  %v3623_v51 = vld [vmem:[%s4890_s3 + $0x1e0] sm:$0xff]  }
  0x10   :  { %2776 = vmatpush3.bf16.msra.mxu0 %v3588_v14  ;;  %603 = vmatprep.mubr.bf16.mxu0 %v2611_v35  ;;  %v3617_v45 = vld [vmem:[%s4890_s3 + $0x1b0] sm:$0xff]   ;;  %v3620_v48 = vld [vmem:[%s4890_s3 + $0x128] sm:$0xff]   ;;  %v3624_v52 = vld [vmem:[%s4890_s3 + $0x120] sm:$0xff]  }
  0x11   :  { %2798 = vmatpush3.bf16.msra.mxu1 %v3589_v15  ;;  %2777 = vmatprep.subr.bf16.mxu0 %v3590_v16  ;;  %v3621_v49 = vld [vmem:[%s4890_s3 + $0x1a8] sm:$0xff]   ;;  %v3625_v53 = vld [vmem:[%s4890_s3 + $0x1a0] sm:$0xff]   ;;  %v3626_v54 = vld [vmem:[%s4890_s3 + $0x158] sm:$0xff]  }
  0x12   :  { %2799 = vmatprep.subr.bf16.mxu1 %v3591_v17  ;;  %643 = vmatprep.mubr.bf16.mxu1 %v2613_v37  ;;  %v3627_v55 = vld [vmem:[%s4890_s3 + $0x1d8] sm:$0xff]   ;;  %v3630_v58 = vld [vmem:[%s4890_s3 + $0x150] sm:$0xff]   ;;  %v3634_v62 = vld [vmem:[%s4890_s3 + $0x148] sm:$0xff]  }
  0x13   :  { %v3628_v56 = vld [vmem:[%s4890_s3 + $0x118] sm:$0xff]   ;;  %v3631_v59 = vld [vmem:[%s4890_s3 + $0x1d0] sm:$0xff]   ;;  %v3635_v63 = vld [vmem:[%s4890_s3 + $0x1c8] sm:$0xff]  }
  0x14   :  { %2778 = vmatpush3.bf16.msra.mxu0 %v3592_v18  ;;  %v3629_v57 = vld [vmem:[%s4890_s3 + $0x198] sm:$0xff]   ;;  %v3632_v60 = vld [vmem:[%s4890_s3 + $0x110] sm:$0xff]   ;;  %v3636_v0 = vld [vmem:[%s4890_s3 + $0x108] sm:$0xff]  }
  0x15   :  { %2800 = vmatpush3.bf16.msra.mxu1 %v3593_v19  ;;  %2779 = vmatprep.subr.bf16.mxu0 %v3594_v20  ;;  %v3633_v61 = vld [vmem:[%s4890_s3 + $0x190] sm:$0xff]   ;;  %v3637_v1 = vld [vmem:[%s4890_s3 + $0x188] sm:$0xff]   ;;  %v3638_v2 = vld [vmem:[%s4890_s3 + $0x140] sm:$0xff]  }
  0x16   :  { %2801 = vmatprep.subr.bf16.mxu1 %v3595_v21  ;;  %v3639_v3 = vld [vmem:[%s4890_s3 + $0x1c0] sm:$0xff]   ;;  %v29_v6 = vld [vmem:[%s4891_s0 + $0x10] sm:$0xff]  ;;  %v30_v9 = vld [vmem:[%s4891_s0 + $0x18] sm:$0xff] }
  0x17   :  { %v3640_v4 = vld [vmem:[%s4890_s3 + $0x100] sm:$0xff]   ;;  %v2614_v7 = vcombine.low %v29_v6, %v29_v6  ;;  %v2615_v8 = vcombine.high %v29_v6, %v29_v6  ;;  %v2616_v10 = vcombine.low %v30_v9, %v30_v9  ;;  %v2617_v11 = vcombine.high %v30_v9, %v30_v9  ;;  %v3646_v12 = vld [vmem:[%s4890_s3 + $0x78] sm:$0xff]   ;;  %v3650_v16 = vld [vmem:[%s4890_s3 + $0x70] sm:$0xff]  }
  0x18   :  { %2780 = vmatpush3.bf16.msra.mxu0 %v3596_v22  ;;  %v3641_v5 = vld [vmem:[%s4890_s3 + $0x180] sm:$0xff]   ;;  %v3647_v13 = vld [vmem:[%s4890_s3 + $0xf8] sm:$0xff]   ;;  %v3651_v17 = vld [vmem:[%s4890_s3 + $0xf0] sm:$0xff]  }
  0x19   :  { %2802 = vmatpush3.bf16.msra.mxu1 %v3597_v23  ;;  %2781 = vmatprep.subr.bf16.mxu0 %v3598_v24  ;;  %v3648_v14 = vld [vmem:[%s4890_s3 + $0x38] sm:$0xff]   ;;  %v3652_v18 = vld [vmem:[%s4890_s3 + $0x30] sm:$0xff]   ;;  %v3654_v20 = vld [vmem:[%s4890_s3 + $0x68] sm:$0xff]  }
  0x1a   :  { %2803 = vmatprep.subr.bf16.mxu1 %v3599_v25  ;;  %v3649_v15 = vld [vmem:[%s4890_s3 + $0xb8] sm:$0xff]   ;;  %v3653_v19 = vld [vmem:[%s4890_s3 + $0xb0] sm:$0xff]   ;;  %v3655_v21 = vld [vmem:[%s4890_s3 + $0xe8] sm:$0xff]  }
  0x1b   :  { %v3656_v22 = vld [vmem:[%s4890_s3 + $0x28] sm:$0xff]   ;;  %v3658_v24 = vld [vmem:[%s4890_s3 + $0x60] sm:$0xff]   ;;  %v3666_v32 = vld [vmem:[%s4890_s3 + $0x50] sm:$0xff]  }
  0x1c   :  { %2782 = vmatpush3.bf16.msra.mxu0 %v3600_v26  ;;  %v3657_v23 = vld [vmem:[%s4890_s3 + $0xa8] sm:$0xff]   ;;  %v3659_v25 = vld [vmem:[%s4890_s3 + $0xe0] sm:$0xff]   ;;  %v3667_v33 = vld [vmem:[%s4890_s3 + $0xd0] sm:$0xff]  }
  0x1d   :  { %2804 = vmatpush3.bf16.msra.mxu1 %v3601_v27  ;;  %2783 = vmatprep.subr.bf16.mxu0 %v3602_v28  ;;  %v3660_v26 = vld [vmem:[%s4890_s3 + $0x20] sm:$0xff]   ;;  %v3662_v28 = vld [vmem:[%s4890_s3 + $0x58] sm:$0xff]   ;;  %v3669_v35 = vld [vmem:[%s4890_s3 + $0x90] sm:$0xff]  }
  0x1e   :  { %2805 = vmatprep.subr.bf16.mxu1 %v3603_v29  ;;  %v3661_v27 = vld [vmem:[%s4890_s3 + $0xa0] sm:$0xff]   ;;  %v3663_v29 = vld [vmem:[%s4890_s3 + $0xd8] sm:$0xff]   ;;  %v3671_v37 = vld [vmem:[%s4890_s3 + $0xc8] sm:$0xff]  }
  0x1f   :  { %v3702_v6 = vld [vmem:[%s4890_s3 + $0x150] sm:$0xff]  }
  0x20   :  { %2784 = vmatpush3.bf16.msra.mxu0 %v3604_v30  ;;  %v3664_v30 = vld [vmem:[%s4890_s3 + $0x18] sm:$0xff]   ;;  %v3705_v9 = vld [vmem:[%s4890_s3 + $0x190] sm:$0xff]  }
  0x21   :  { %2806 = vmatpush3.bf16.msra.mxu1 %v3605_v31  ;;  %2813 = vmatprep.subr.bf16.mxu0 %v3610_v38  ;;  %v3665_v31 = vld [vmem:[%s4890_s3 + $0x98] sm:$0xff]   ;;  %v3672_v38 = vld [vmem:[%s4890_s3 + $0x8] sm:$0xff]  }
  0x22   :  { %2835 = vmatprep.subr.bf16.mxu1 %v3611_v39  ;;  %v3673_v39 = vld [vmem:[%s4890_s3 + $0x88] sm:$0xff]  }
  0x23   :  { %604 = vmatmul.mubr.bf16.vlgmr.msra.gmra.mxu0 %v2610_v34  ;;  %v3668_v34 = vld [vmem:[%s4890_s3 + $0x10] sm:$0xff]  }
  0x24   :  { %644 = vmatmul.mubr.bf16.vlgmr.msra.gmra.mxu1 %v2612_v36  ;;  %2814 = vmatpush3.bf16.msra.mxu0 %v3612_v40  ;;  %v3670_v36 = vld [vmem:[%s4890_s3 + $0x48] sm:$0xff]   ;;  %v3674_v40 = vld [vmem:[%s4890_s3 + $0x40] sm:$0xff]  }
  0x25   :  { %2836 = vmatpush3.bf16.msra.mxu1 %v3613_v41  ;;  %2815 = vmatprep.subr.bf16.mxu0 %v3614_v42  ;;  %v3675_v41 = vld [vmem:[%s4890_s3 + $0xc0] sm:$0xff]  }
  0x26   :  { %2837 = vmatprep.subr.bf16.mxu1 %v3615_v43  ;;  %683 = vmatprep.mubr.bf16.mxu0 %v2615_v8  ;;  %v3676_v42 = vld [vmem:[%s4890_s3] sm:$0xff]   ;;  %v3704_v8 = vld [vmem:[%s4890_s3 + $0x110] sm:$0xff]  }
  0x27   :  { %723 = vmatprep.mubr.bf16.mxu1 %v2617_v11  ;;  %v3677_v43 = vld [vmem:[%s4890_s3 + $0x80] sm:$0xff]   ;;  %v3707_v11 = vld [vmem:[%s4890_s3 + $0x1c8] sm:$0xff]  }
  0x28   :  { %2816 = vmatpush3.bf16.msra.mxu0 %v3616_v44  ;;  %v732_v44 = vld [vmem:[%s4892_s1] sm:$0xff] }
  0x29   :  { %2838 = vmatpush3.bf16.msra.mxu1 %v3617_v45  ;;  %2817 = vmatprep.subr.bf16.mxu0 %v3618_v46  ;;  %v733_v45 = vld [vmem:[%s4892_s1 + $0x8] sm:$0xff]  ;;  %v2682_v46 = vcombine.low %v732_v44, %v732_v44 }
  0x2a   :  { %2839 = vmatprep.subr.bf16.mxu1 %v3619_v47  ;;  %v2683_v47 = vcombine.high %v732_v44, %v732_v44 }
  0x2c   :  { %2818 = vmatpush3.bf16.msra.mxu0 %v3620_v48  ;;  %v2684_v48 = vcombine.low %v733_v45, %v733_v45 }
  0x2d   :  { %2840 = vmatpush3.bf16.msra.mxu1 %v3621_v49  ;;  %2819 = vmatprep.subr.bf16.mxu0 %v3622_v50  ;;  %v2685_v49 = vcombine.high %v733_v45, %v733_v45  ;;  %v3682_v50 = vld [vmem:[%s4890_s3 + $0x178] sm:$0xff]  }
  0x2e   :  { %2841 = vmatprep.subr.bf16.mxu1 %v3623_v51  ;;  %v3683_v51 = vld [vmem:[%s4890_s3 + $0x1f8] sm:$0xff]  }
  0x30   :  { %2820 = vmatpush3.bf16.msra.mxu0 %v3624_v52  ;;  %v3684_v52 = vld [vmem:[%s4890_s3 + $0x138] sm:$0xff]  }
  0x31   :  { %2842 = vmatpush3.bf16.msra.mxu1 %v3625_v53  ;;  %2821 = vmatprep.subr.bf16.mxu0 %v3626_v54  ;;  %v3685_v53 = vld [vmem:[%s4890_s3 + $0x1b8] sm:$0xff]   ;;  %v3686_v54 = vld [vmem:[%s4890_s3 + $0x170] sm:$0xff]  }
  0x32   :  { %2843 = vmatprep.subr.bf16.mxu1 %v3627_v55  ;;  %v3687_v55 = vld [vmem:[%s4890_s3 + $0x1f0] sm:$0xff]  }
  0x34   :  { %2822 = vmatpush3.bf16.msra.mxu0 %v3628_v56  ;;  %v3688_v56 = vld [vmem:[%s4890_s3 + $0x130] sm:$0xff]  }
  0x35   :  { %2844 = vmatpush3.bf16.msra.mxu1 %v3629_v57  ;;  %2823 = vmatprep.subr.bf16.mxu0 %v3630_v58  ;;  %v3689_v57 = vld [vmem:[%s4890_s3 + $0x1b0] sm:$0xff]   ;;  %v3690_v58 = vld [vmem:[%s4890_s3 + $0x168] sm:$0xff]  }
  0x36   :  { %2845 = vmatprep.subr.bf16.mxu1 %v3631_v59  ;;  %v3691_v59 = vld [vmem:[%s4890_s3 + $0x1e8] sm:$0xff]  }
  0x38   :  { %2824 = vmatpush3.bf16.msra.mxu0 %v3632_v60  ;;  %v3692_v60 = vld [vmem:[%s4890_s3 + $0x128] sm:$0xff]  }
  0x39   :  { %2846 = vmatpush3.bf16.msra.mxu1 %v3633_v61  ;;  %2825 = vmatprep.subr.bf16.mxu0 %v3634_v62  ;;  %v3693_v61 = vld [vmem:[%s4890_s3 + $0x1a8] sm:$0xff]   ;;  %v3694_v62 = vld [vmem:[%s4890_s3 + $0x160] sm:$0xff]  }
  0x3a   :  { %2847 = vmatprep.subr.bf16.mxu1 %v3635_v63  ;;  %v3695_v63 = vld [vmem:[%s4890_s3 + $0x1e0] sm:$0xff]  }
  0x3c   :  { %2826 = vmatpush3.bf16.msra.mxu0 %v3636_v0  ;;  %v3696_v0 = vld [vmem:[%s4890_s3 + $0x120] sm:$0xff]  }
  0x3d   :  { %2848 = vmatpush3.bf16.msra.mxu1 %v3637_v1  ;;  %2827 = vmatprep.subr.bf16.mxu0 %v3638_v2  ;;  %v3697_v1 = vld [vmem:[%s4890_s3 + $0x1a0] sm:$0xff]   ;;  %v3698_v2 = vld [vmem:[%s4890_s3 + $0x158] sm:$0xff]  }
  0x3e   :  { %2849 = vmatprep.subr.bf16.mxu1 %v3639_v3  ;;  %v3699_v3 = vld [vmem:[%s4890_s3 + $0x1d8] sm:$0xff]  }
  0x40   :  { %2828 = vmatpush3.bf16.msra.mxu0 %v3640_v4  ;;  %v3700_v4 = vld [vmem:[%s4890_s3 + $0x118] sm:$0xff]  }
  0x41   :  { %2850 = vmatpush3.bf16.msra.mxu1 %v3641_v5  ;;  %2857 = vmatprep.subr.bf16.mxu0 %v3646_v12  ;;  %v3701_v5 = vld [vmem:[%s4890_s3 + $0x198] sm:$0xff]   ;;  %v3708_v12 = vld [vmem:[%s4890_s3 + $0x108] sm:$0xff]  }
  0x42   :  { %2879 = vmatprep.subr.bf16.mxu1 %v3647_v13  ;;  %v3709_v13 = vld [vmem:[%s4890_s3 + $0x188] sm:$0xff]  }
  0x43   :  { %684 = vmatmul.mubr.bf16.vlgmr.msra.gmra.mxu0 %v2614_v7  ;;  %v3703_v7 = vld [vmem:[%s4890_s3 + $0x1d0] sm:$0xff]  }
  0x44   :  { %724 = vmatmul.mubr.bf16.vlgmr.msra.gmra.mxu1 %v2616_v10  ;;  %2858 = vmatpush3.bf16.msra.mxu0 %v3648_v14  ;;  %v3706_v10 = vld [vmem:[%s4890_s3 + $0x148] sm:$0xff]   ;;  %v3710_v14 = vld [vmem:[%s4890_s3 + $0x140] sm:$0xff]  }
  0x45   :  { %2880 = vmatpush3.bf16.msra.mxu1 %v3649_v15  ;;  %2859 = vmatprep.subr.bf16.mxu0 %v3650_v16  ;;  %v3711_v15 = vld [vmem:[%s4890_s3 + $0x1c0] sm:$0xff]  }
  0x46   :  { %2881 = vmatprep.subr.bf16.mxu1 %v3651_v17  ;;  %1308 = vmatprep.mubr.bf16.mxu0 %v2683_v47  ;;  %v3712_v16 = vld [vmem:[%s4890_s3 + $0x100] sm:$0xff]  }
  0x47   :  { %1348 = vmatprep.mubr.bf16.mxu1 %v2685_v49  ;;  %v3713_v17 = vld [vmem:[%s4890_s3 + $0x180] sm:$0xff]  }
  0x48   :  { %2860 = vmatpush3.bf16.msra.mxu0 %v3652_v18  ;;  %v734_v18 = vld [vmem:[%s4892_s1 + $0x10] sm:$0xff] }
  0x49   :  { %2882 = vmatpush3.bf16.msra.mxu1 %v3653_v19  ;;  %2861 = vmatprep.subr.bf16.mxu0 %v3654_v20  ;;  %v735_v19 = vld [vmem:[%s4892_s1 + $0x18] sm:$0xff]  ;;  %v2686_v20 = vcombine.low %v734_v18, %v734_v18 }
  0x4a   :  { %2883 = vmatprep.subr.bf16.mxu1 %v3655_v21  ;;  %v2687_v21 = vcombine.high %v734_v18, %v734_v18 }
  0x4c   :  { %2862 = vmatpush3.bf16.msra.mxu0 %v3656_v22  ;;  %v2688_v22 = vcombine.low %v735_v19, %v735_v19 }
  0x4d   :  { %2884 = vmatpush3.bf16.msra.mxu1 %v3657_v23  ;;  %2863 = vmatprep.subr.bf16.mxu0 %v3658_v24  ;;  %v2689_v23 = vcombine.high %v735_v19, %v735_v19  ;;  %v3771_v24 = vmov 0.0  }
  0x4e   :  { %2885 = vmatprep.subr.bf16.mxu1 %v3659_v25  ;;  %v4226_v25 = vld [vmem:[%s4893_s5 + $0x78] sm:$0xff] }
  0x50   :  { %2864 = vmatpush3.bf16.msra.mxu0 %v3660_v26  ;;  %v4232_v26 = vld [vmem:[%s4893_s5 + $0x70] sm:$0xff] }
  0x51   :  { %2886 = vmatpush3.bf16.msra.mxu1 %v3661_v27  ;;  %2865 = vmatprep.subr.bf16.mxu0 %v3662_v28  ;;  %v4239_v27 = vld [vmem:[%s4893_s5 + $0x68] sm:$0xff]  ;;  %v4248_v28 = vld [vmem:[%s4893_s5 + $0x60] sm:$0xff] }
  0x52   :  { %2887 = vmatprep.subr.bf16.mxu1 %v3663_v29  ;;  %v4257_v29 = vld [vmem:[%s4893_s5 + $0x58] sm:$0xff] }
  0x54   :  { %2866 = vmatpush3.bf16.msra.mxu0 %v3664_v30  ;;  %v4267_v30 = vld [vmem:[%s4893_s5 + $0x50] sm:$0xff] }
  0x55   :  { %2888 = vmatpush3.bf16.msra.mxu1 %v3665_v31  ;;  %2867 = vmatprep.subr.bf16.mxu0 %v3666_v32  ;;  %v4276_v31 = vld [vmem:[%s4893_s5 + $0x48] sm:$0xff]  ;;  %v4285_v32 = vld [vmem:[%s4893_s5 + $0x40] sm:$0xff] }
  0x56   :  { %2889 = vmatprep.subr.bf16.mxu1 %v3667_v33  ;;  %v4294_v33 = vld [vmem:[%s4893_s5 + $0x38] sm:$0xff] }
  0x58   :  { %2868 = vmatpush3.bf16.msra.mxu0 %v3668_v34  ;;  %v4303_v34 = vld [vmem:[%s4893_s5 + $0x30] sm:$0xff] }
  0x59   :  { %2890 = vmatpush3.bf16.msra.mxu1 %v3669_v35  ;;  %2869 = vmatprep.subr.bf16.mxu0 %v3670_v36  ;;  %v4312_v35 = vld [vmem:[%s4893_s5 + $0x28] sm:$0xff]  ;;  %v4321_v36 = vld [vmem:[%s4893_s5 + $0x20] sm:$0xff] }
  0x5a   :  { %2891 = vmatprep.subr.bf16.mxu1 %v3671_v37  ;;  %v4330_v37 = vld [vmem:[%s4893_s5 + $0x18] sm:$0xff] }
  0x5c   :  { %2870 = vmatpush3.bf16.msra.mxu0 %v3672_v38  ;;  %v4339_v38 = vld [vmem:[%s4893_s5 + $0x10] sm:$0xff] }
  0x5d   :  { %2892 = vmatpush3.bf16.msra.mxu1 %v3673_v39  ;;  %2871 = vmatprep.subr.bf16.mxu0 %v3674_v40  ;;  %v4348_v39 = vld [vmem:[%s4893_s5 + $0x8] sm:$0xff]  ;;  %v4357_v40 = vld [vmem:[%s4893_s5] sm:$0xff] }
  0x5e   :  { %2893 = vmatprep.subr.bf16.mxu1 %v3675_v41 }
  0x60   :  { %2872 = vmatpush3.bf16.msra.mxu0 %v3676_v42 }
  0x61   :  { %2894 = vmatpush3.bf16.msra.mxu1 %v3677_v43  ;;  %2901 = vmatprep.subr.bf16.mxu0 %v3682_v50 }
  0x62   :  { %2923 = vmatprep.subr.bf16.mxu1 %v3683_v51 }
  0x63   :  { %1309 = vmatmul.mubr.bf16.vlgmr.msra.gmra.mxu0 %v2682_v46 }
  0x64   :  { %1349 = vmatmul.mubr.bf16.vlgmr.msra.gmra.mxu1 %v2684_v48  ;;  %2902 = vmatpush3.bf16.msra.mxu0 %v3684_v52 }
  0x65   :  { %2924 = vmatpush3.bf16.msra.mxu1 %v3685_v53  ;;  %2903 = vmatprep.subr.bf16.mxu0 %v3686_v54 }
  0x66   :  { %2925 = vmatprep.subr.bf16.mxu1 %v3687_v55  ;;  %1388 = vmatprep.mubr.bf16.mxu0 %v2687_v21 }
  0x67   :  { %1428 = vmatprep.mubr.bf16.mxu1 %v2689_v23 }
  0x68   :  { %2904 = vmatpush3.bf16.msra.mxu0 %v3688_v56 }
  0x69   :  { %2926 = vmatpush3.bf16.msra.mxu1 %v3689_v57  ;;  %2905 = vmatprep.subr.bf16.mxu0 %v3690_v58 }
  0x6a   :  { %2927 = vmatprep.subr.bf16.mxu1 %v3691_v59 }
  0x6c   :  { %2906 = vmatpush3.bf16.msra.mxu0 %v3692_v60 }
  0x6d   :  { %2928 = vmatpush3.bf16.msra.mxu1 %v3693_v61  ;;  %2907 = vmatprep.subr.bf16.mxu0 %v3694_v62 }
  0x6e   :  { %2929 = vmatprep.subr.bf16.mxu1 %v3695_v63  ;;  %v4375_v63 = vld [vmem:[%s4894_s4] ss:$0 sm:$0xff] }
  0x70   :  { %2908 = vmatpush3.bf16.msra.mxu0 %v3696_v0 }
  0x71   :  { %2930 = vmatpush3.bf16.msra.mxu1 %v3697_v1  ;;  %2909 = vmatprep.subr.bf16.mxu0 %v3698_v2 }
  0x72   :  { %2931 = vmatprep.subr.bf16.mxu1 %v3699_v3 }
  0x74   :  { %2910 = vmatpush3.bf16.msra.mxu0 %v3700_v4 }
  0x75   :  { %2932 = vmatpush3.bf16.msra.mxu1 %v3701_v5  ;;  %2911 = vmatprep.subr.bf16.mxu0 %v3702_v6 }
  0x76   :  { %2933 = vmatprep.subr.bf16.mxu1 %v3703_v7 }
  0x78   :  { %2912 = vmatpush3.bf16.msra.mxu0 %v3704_v8 }
  0x79   :  { %2934 = vmatpush3.bf16.msra.mxu1 %v3705_v9  ;;  %2913 = vmatprep.subr.bf16.mxu0 %v3706_v10 }
  0x7a   :  { %2935 = vmatprep.subr.bf16.mxu1 %v3707_v11 }
  0x7c   :  { %2914 = vmatpush3.bf16.msra.mxu0 %v3708_v12 }
  0x7d   :  { %2936 = vmatpush3.bf16.msra.mxu1 %v3709_v13  ;;  %2915 = vmatprep.subr.bf16.mxu0 %v3710_v14 }
  0x7e   :  { %2937 = vmatprep.subr.bf16.mxu1 %v3711_v15 }
  0x80   :  { %2916 = vmatpush3.bf16.msra.mxu0 %v3712_v16 }
  0x81   :  { %2938 = vmatpush3.bf16.msra.mxu1 %v3713_v17  ;;  %3149 = vmatprep.subr.mxu0 %v3771_v24 }
  0x82   :  { %3184 = vmatprep.subr.mxu1 %v3771_v24 }
  0x83   :  { %1389 = vmatmul.mubr.bf16.vlgmr.msra.gmra.mxu0 %v2686_v20 }
  0x84   :  { %1429 = vmatmul.mubr.bf16.vlgmr.msra.gmra.mxu1 %v2688_v22  ;;  %3150 = vmatpush3.msra.mxu0 %v4226_v25 }
  0x85   :  { %3151 = vmatprep.subr.mxu0 %v3771_v24  ;;  %3185 = vmatpush3.msra.mxu1 %v4226_v25 }
  0x86   :  { %3152 = vmatpush3.msra.mxu0 %v4232_v26  ;;  %3186 = vmatprep.subr.mxu1 %v3771_v24 }
  0x87   :  { %3153 = vmatprep.subr.mxu0 %v3771_v24  ;;  %3187 = vmatpush3.msra.mxu1 %v4232_v26 }
  0x88   :  { %3154 = vmatpush3.msra.mxu0 %v4239_v27  ;;  %3188 = vmatprep.subr.mxu1 %v3771_v24 }
  0x89   :  { %3155 = vmatprep.subr.mxu0 %v3771_v24  ;;  %3189 = vmatpush3.msra.mxu1 %v4239_v27 }
  0x8a   :  { %3156 = vmatpush3.msra.mxu0 %v4248_v28  ;;  %3181 = vmatprep.mubr.msk.f32.mxu0 %vm3772_vm0, %v3771_v24 }
  0x8b   :  { %3157 = vmatprep.subr.mxu0 %v3771_v24  ;;  %3190 = vmatprep.subr.mxu1 %v3771_v24 }
  0x8c   :  { %3158 = vmatpush3.msra.mxu0 %v4257_v29  ;;  %3191 = vmatpush3.msra.mxu1 %v4248_v28 }
  0x8d   :  { %3159 = vmatprep.subr.mxu0 %v3771_v24  ;;  %3192 = vmatprep.subr.mxu1 %v3771_v24 }
  0x8e   :  { %3160 = vmatpush3.msra.mxu0 %v4267_v30  ;;  %3193 = vmatpush3.msra.mxu1 %v4257_v29 }
  0x8f   :  { %3161 = vmatprep.subr.mxu0 %v3771_v24  ;;  %3194 = vmatprep.subr.mxu1 %v3771_v24 }
  0x90   :  { %3162 = vmatpush3.msra.mxu0 %v4276_v31  ;;  %3195 = vmatpush3.msra.mxu1 %v4267_v30 }
  0x91   :  { %3163 = vmatprep.subr.mxu0 %v3771_v24  ;;  %3196 = vmatprep.subr.mxu1 %v3771_v24 }
  0x92   :  { %3164 = vmatpush3.msra.mxu0 %v4285_v32  ;;  %3197 = vmatpush3.msra.mxu1 %v4276_v31 }
  0x93   :  { %3165 = vmatprep.subr.mxu0 %v3771_v24  ;;  %3198 = vmatprep.subr.mxu1 %v3771_v24 }
  0x94   :  { %3166 = vmatpush3.msra.mxu0 %v4294_v33  ;;  %3199 = vmatpush3.msra.mxu1 %v4285_v32 }
  0x95   :  { %3167 = vmatprep.subr.mxu0 %v3771_v24  ;;  %3200 = vmatprep.subr.mxu1 %v3771_v24 }
  0x96   :  { %3168 = vmatpush3.msra.mxu0 %v4303_v34  ;;  %3201 = vmatpush3.msra.mxu1 %v4294_v33 }
  0x97   :  { %3169 = vmatprep.subr.mxu0 %v3771_v24  ;;  %3202 = vmatprep.subr.mxu1 %v3771_v24 }
  0x98   :  { %3170 = vmatpush3.msra.mxu0 %v4312_v35  ;;  %3203 = vmatpush3.msra.mxu1 %v4303_v34 }
  0x99   :  { %3171 = vmatprep.subr.mxu0 %v3771_v24  ;;  %3204 = vmatprep.subr.mxu1 %v3771_v24 }
  0x9a   :  { %3172 = vmatpush3.msra.mxu0 %v4321_v36  ;;  %3205 = vmatpush3.msra.mxu1 %v4312_v35 }
  0x9b   :  { %3173 = vmatprep.subr.mxu0 %v3771_v24  ;;  %3206 = vmatprep.subr.mxu1 %v3771_v24 }
  0x9c   :  { %3174 = vmatpush3.msra.mxu0 %v4330_v37  ;;  %3207 = vmatpush3.msra.mxu1 %v4321_v36 }
  0x9d   :  { %3175 = vmatprep.subr.mxu0 %v3771_v24  ;;  %3208 = vmatprep.subr.mxu1 %v3771_v24 }
  0x9e   :  { %3176 = vmatpush3.msra.mxu0 %v4339_v38  ;;  %3209 = vmatpush3.msra.mxu1 %v4330_v37 }
  0x9f   :  { %3177 = vmatprep.subr.mxu0 %v3771_v24  ;;  %3210 = vmatprep.subr.mxu1 %v3771_v24 }
  0xa0   :  { %3178 = vmatpush3.msra.mxu0 %v4348_v39  ;;  %3211 = vmatpush3.msra.mxu1 %v4339_v38 }
  0xa1   :  { %3179 = vmatprep.subr.mxu0 %v3771_v24  ;;  %3212 = vmatprep.subr.mxu1 %v3771_v24 }
  0xa2   :  { %3180 = vmatpush3.msra.mxu0 %v4357_v40  ;;  %3213 = vmatpush3.msra.mxu1 %v4348_v39 }
  0xa3   :  { %3219 = vmatprep.subr.mxu0 %v3771_v24  ;;  %3214 = vmatprep.subr.mxu1 %v3771_v24 }
  0xa4   :  { %3215 = vmatpush3.msra.mxu1 %v4357_v40  ;;  %3216 = vmatprep.mubr.msk.f32.mxu1 %vm3772_vm0, %v3771_v24 }
  0xa5   :  { %3254 = vmatprep.subr.mxu1 %v3771_v24 }
  0xe3   :  { %v2785_v41 = vpop.f32.mrf.mxu0 }
  0xe4   :  { %v2807_v42 = vpop.f32.mrf.mxu1 }
  0xe5   :  { %v2786_v43 = vpop.f32.mrf.mxu0 }
  0xe6   :  { %v2808_v44 = vpop.f32.mrf.mxu1  ;;  %v2787_v49 = vadd.f32 %v2786_v43, %v2785_v41 }
  0xe7   :  { %v2788_v45 = vpop.f32.mrf.mxu0  ;;  %v2809_v50 = vadd.f32 %v2808_v44, %v2807_v42 }
  0xe8   :  { %v2810_v46 = vpop.f32.mrf.mxu1 }
  0xe9   :  { %v2789_v47 = vpop.f32.mrf.mxu0  ;;  %v646_v55 = vadd.f32 %v2809_v50, %v2787_v49 }
  0xea   :  { %v2811_v48 = vpop.f32.mrf.mxu1 }
 0x103   :  { %v2829_v51 = vpop.f32.mrf.mxu0 }
 0x104   :  { %v2851_v52 = vpop.f32.mrf.mxu1 }
 0x105   :  { %v2830_v53 = vpop.f32.mrf.mxu0 }
 0x106   :  { %v2852_v54 = vpop.f32.mrf.mxu1  ;;  %v2831_v56 = vadd.f32 %v2830_v53, %v2829_v51 }
 0x107   :  { %v2853_v57 = vadd.f32 %v2852_v54, %v2851_v52  ;;  %v2832_v58 = vpop.f32.mrf.mxu0 }
 0x108   :  { %v2854_v59 = vpop.f32.mrf.mxu1  ;;  %v686_v60 = vadd.f32 %v2831_v56, %v646_v55 }
 0x109   :  { %v2833_v61 = vpop.f32.mrf.mxu0 }
 0x10a   :  { %v2855_v62 = vpop.f32.mrf.mxu1  ;;  %v4377_v0 = vadd.f32 %v2853_v57, %v686_v60 }
 0x10c   :  { %v4381_v1 = vadd.f32 %v4375_v63, %v4377_v0  ;;  %v1579_v43 = vmul.f32 0.2, %v4377_v0  ;;  %v1672_v45 = vmul.f32 0.26666668, %v4377_v0  ;;  %v1764_v55 = vmul.f32 0.33333334, %v4377_v0 }
 0x10d   :  { %v1856_v56 = vmul.f32 0.4, %v4377_v0 }
 0x10e   :  { %v1449_v2 = vmax.f32 %v4381_v1, 0.0 }
 0x110   :  { %3182 = vmatmul.mubr.f32.vlgmr.msra.gmra.mxu0 %v1449_v2 }
 0x111   :  { %3220 = vmatpush3.msra.mxu0 %v4226_v25  ;;  %3251 = vmatprep.mubr.msk.f32.mxu0 %vm3772_vm0, %v3771_v24 }
 0x112   :  { %3221 = vmatprep.subr.mxu0 %v3771_v24 }
 0x113   :  { %3222 = vmatpush3.msra.mxu0 %v4232_v26 }
 0x114   :  { %3223 = vmatprep.subr.mxu0 %v3771_v24 }
 0x115   :  { %3224 = vmatpush3.msra.mxu0 %v4239_v27 }
 0x116   :  { %3225 = vmatprep.subr.mxu0 %v3771_v24 }
 0x117   :  { %3226 = vmatpush3.msra.mxu0 %v4248_v28 }
 0x118   :  { %3227 = vmatprep.subr.mxu0 %v3771_v24 }
 0x119   :  { %3228 = vmatpush3.msra.mxu0 %v4257_v29 }
 0x11a   :  { %3229 = vmatprep.subr.mxu0 %v3771_v24 }
 0x11b   :  { %3230 = vmatpush3.msra.mxu0 %v4267_v30 }
 0x11c   :  { %3231 = vmatprep.subr.mxu0 %v3771_v24 }
 0x11d   :  { %3232 = vmatpush3.msra.mxu0 %v4276_v31 }
 0x11e   :  { %3233 = vmatprep.subr.mxu0 %v3771_v24 }
 0x11f   :  { %3234 = vmatpush3.msra.mxu0 %v4285_v32 }
 0x120   :  { %3235 = vmatprep.subr.mxu0 %v3771_v24 }
 0x121   :  { %3236 = vmatpush3.msra.mxu0 %v4294_v33 }
 0x122   :  { %3237 = vmatprep.subr.mxu0 %v3771_v24 }
 0x123   :  { %v2873_v3 = vpop.f32.mrf.mxu0  ;;  %3238 = vmatpush3.msra.mxu0 %v4303_v34 }
 0x124   :  { %v2895_v4 = vpop.f32.mrf.mxu1  ;;  %3239 = vmatprep.subr.mxu0 %v3771_v24 }
 0x125   :  { %v2874_v5 = vpop.f32.mrf.mxu0  ;;  %3240 = vmatpush3.msra.mxu0 %v4312_v35 }
 0x126   :  { %v2896_v6 = vpop.f32.mrf.mxu1  ;;  %3241 = vmatprep.subr.mxu0 %v3771_v24  ;;  %v2875_v11 = vadd.f32 %v2874_v5, %v2873_v3  ;;  %v1948_v5 = vmul.f32 0.46666667, %v4377_v0 }
 0x127   :  { %v2876_v7 = vpop.f32.mrf.mxu0  ;;  %3242 = vmatpush3.msra.mxu0 %v4321_v36  ;;  %v2897_v12 = vadd.f32 %v2896_v6, %v2895_v4  ;;  %v2040_v6 = vmul.f32 0.53333336, %v4377_v0 }
 0x128   :  { %v2898_v8 = vpop.f32.mrf.mxu1  ;;  %3243 = vmatprep.subr.mxu0 %v3771_v24 }
 0x129   :  { %v2877_v9 = vpop.f32.mrf.mxu0  ;;  %3244 = vmatpush3.msra.mxu0 %v4330_v37  ;;  %v1351_v16 = vadd.f32 %v2897_v12, %v2875_v11 }
 0x12a   :  { %v2899_v10 = vpop.f32.mrf.mxu1  ;;  %3245 = vmatprep.subr.mxu0 %v3771_v24 }
 0x12b   :  { %3246 = vmatpush3.msra.mxu0 %v4339_v38 }
 0x12c   :  { %3247 = vmatprep.subr.mxu0 %v3771_v24 }
 0x12d   :  { %3248 = vmatpush3.msra.mxu0 %v4348_v39 }
 0x12e   :  { %3249 = vmatprep.subr.mxu0 %v3771_v24 }
 0x12f   :  { %3250 = vmatpush3.msra.mxu0 %v4357_v40 }
 0x130   :  { %3289 = vmatprep.subr.mxu0 %v3771_v24 }
 0x143   :  { %v2917_v13 = vpop.f32.mrf.mxu0 }
 0x144   :  { %v2939_v14 = vpop.f32.mrf.mxu1 }
 0x145   :  { %v2918_v15 = vpop.f32.mrf.mxu0 }
 0x146   :  { %v2919_v17 = vadd.f32 %v2918_v15, %v2917_v13  ;;  %v2940_v18 = vpop.f32.mrf.mxu1  ;;  %v2132_v15 = vmul.f32 0.6, %v4377_v0 }
 0x147   :  { %v2920_v19 = vpop.f32.mrf.mxu0  ;;  %v2941_v21 = vadd.f32 %v2940_v18, %v2939_v14 }
 0x148   :  { %v1391_v20 = vadd.f32 %v2919_v17, %v1351_v16  ;;  %v2942_v22 = vpop.f32.mrf.mxu1  ;;  %v2224_v16 = vmul.f32 0.6666667, %v4377_v0 }
 0x149   :  { %v2921_v23 = vpop.f32.mrf.mxu0 }
 0x14a   :  { %v4420_v41 = vadd.f32 %v2941_v21, %v1391_v20  ;;  %v2943_v42 = vpop.f32.mrf.mxu1 }
 0x14c   :  { %v1581_v44 = vmul.f32 0.8, %v4420_v41  ;;  %v1673_v46 = vmul.f32 0.73333335, %v4420_v41  ;;  %v1765_v53 = vmul.f32 0.6666667, %v4420_v41 }
 0x14d   :  { %v1857_v54 = vmul.f32 0.6, %v4420_v41  ;;  %v1949_v3 = vmul.f32 0.53333336, %v4420_v41  ;;  %v2041_v4 = vmul.f32 0.46666667, %v4420_v41 }
 0x14e   :  { %v1582_v47 = vadd.f32 %v1581_v44, %v1579_v43  ;;  %v1674_v48 = vadd.f32 %v1673_v46, %v1672_v45  ;;  %v1766_v57 = vadd.f32 %v1765_v53, %v1764_v55  ;;  %v2133_v13 = vmul.f32 0.4, %v4420_v41 }
 0x14f   :  { %v1858_v58 = vadd.f32 %v1857_v54, %v1856_v56  ;;  %v1950_v7 = vadd.f32 %v1949_v3, %v1948_v5  ;;  %v2042_v8 = vadd.f32 %v2041_v4, %v2040_v6  ;;  %v2225_v14 = vmul.f32 0.33333334, %v4420_v41 }
 0x150   :  { %v1583_v49 = vadd.f32 %v4375_v63, %v1582_v47  ;;  %v1675_v50 = vadd.f32 %v4375_v63, %v1674_v48  ;;  %v1767_v59 = vadd.f32 %v4375_v63, %v1766_v57  ;;  %v2134_v17 = vadd.f32 %v2133_v13, %v2132_v15 }
 0x151   :  { %v1859_v60 = vadd.f32 %v4375_v63, %v1858_v58  ;;  %v1951_v9 = vadd.f32 %v4375_v63, %v1950_v7  ;;  %v2043_v10 = vadd.f32 %v4375_v63, %v2042_v8  ;;  %v2226_v18 = vadd.f32 %v2225_v14, %v2224_v16 }
 0x152   :  { %v1584_v51 = vmax.f32 %v1583_v49, 0.0  ;;  %v1676_v52 = vmax.f32 %v1675_v50, 0.0  ;;  %v1768_v61 = vmax.f32 %v1767_v59, 0.0  ;;  %v2135_v19 = vadd.f32 %v4375_v63, %v2134_v17 }
 0x153   :  { %v1860_v62 = vmax.f32 %v1859_v60, 0.0  ;;  %v1952_v11 = vmax.f32 %v1951_v9, 0.0  ;;  %v2044_v12 = vmax.f32 %v2043_v10, 0.0  ;;  %v2227_v20 = vadd.f32 %v4375_v63, %v2226_v18 }
 0x154   :  { %3217 = vmatmul.mubr.f32.vlgmr.msra.gmra.mxu1 %v1584_v51  ;;  %3252 = vmatmul.mubr.f32.vlgmr.msra.gmra.mxu0 %v1676_v52  ;;  %v2136_v21 = vmax.f32 %v2135_v19, 0.0  ;;  %v2317_v23 = vmul.f32 0.26666668, %v4420_v41  ;;  %v2409_v42 = vmul.f32 0.2, %v4420_v41 }
 0x155   :  { %3255 = vmatpush3.msra.mxu1 %v4226_v25  ;;  %3290 = vmatpush3.msra.mxu0 %v4226_v25  ;;  %v2228_v22 = vmax.f32 %v2227_v20, 0.0  ;;  %v2316_v44 = vmul.f32 0.73333335, %v4377_v0  ;;  %v2408_v45 = vmul.f32 0.8, %v4377_v0 }
 0x156   :  { %3256 = vmatprep.subr.mxu1 %v3771_v24  ;;  %3291 = vmatprep.subr.mxu0 %v3771_v24 }
 0x157   :  { %3257 = vmatpush3.msra.mxu1 %v4232_v26  ;;  %3292 = vmatpush3.msra.mxu0 %v4232_v26  ;;  %v2318_v47 = vadd.f32 %v2317_v23, %v2316_v44  ;;  %v2410_v48 = vadd.f32 %v2409_v42, %v2408_v45 }
 0x158   :  { %3258 = vmatprep.subr.mxu1 %v3771_v24  ;;  %3293 = vmatprep.subr.mxu0 %v3771_v24 }
 0x159   :  { %3259 = vmatpush3.msra.mxu1 %v4239_v27  ;;  %3294 = vmatpush3.msra.mxu0 %v4239_v27  ;;  %v2319_v49 = vadd.f32 %v4375_v63, %v2318_v47  ;;  %v2411_v50 = vadd.f32 %v4375_v63, %v2410_v48 }
 0x15a   :  { %3260 = vmatprep.subr.mxu1 %v3771_v24  ;;  %3295 = vmatprep.subr.mxu0 %v3771_v24 }
 0x15b   :  { %3261 = vmatpush3.msra.mxu1 %v4248_v28  ;;  %3296 = vmatpush3.msra.mxu0 %v4248_v28  ;;  %v2320_v51 = vmax.f32 %v2319_v49, 0.0  ;;  %v2412_v52 = vmax.f32 %v2411_v50, 0.0 }
 0x15c   :  { %3262 = vmatprep.subr.mxu1 %v3771_v24  ;;  %3297 = vmatprep.subr.mxu0 %v3771_v24 }
 0x15d   :  { %3263 = vmatpush3.msra.mxu1 %v4257_v29  ;;  %3298 = vmatpush3.msra.mxu0 %v4257_v29 }
 0x15e   :  { %3264 = vmatprep.subr.mxu1 %v3771_v24  ;;  %3299 = vmatprep.subr.mxu0 %v3771_v24 }
 0x15f   :  { %3265 = vmatpush3.msra.mxu1 %v4267_v30  ;;  %3300 = vmatpush3.msra.mxu0 %v4267_v30 }
 0x160   :  { %3266 = vmatprep.subr.mxu1 %v3771_v24  ;;  %3301 = vmatprep.subr.mxu0 %v3771_v24 }
 0x161   :  { %3267 = vmatpush3.msra.mxu1 %v4276_v31  ;;  %3302 = vmatpush3.msra.mxu0 %v4276_v31 }
 0x162   :  { %3268 = vmatprep.subr.mxu1 %v3771_v24  ;;  %3303 = vmatprep.subr.mxu0 %v3771_v24 }
 0x163   :  { %3269 = vmatpush3.msra.mxu1 %v4285_v32  ;;  %3304 = vmatpush3.msra.mxu0 %v4285_v32 }
 0x164   :  { %3270 = vmatprep.subr.mxu1 %v3771_v24  ;;  %3305 = vmatprep.subr.mxu0 %v3771_v24 }
 0x165   :  { %3271 = vmatpush3.msra.mxu1 %v4294_v33  ;;  %3306 = vmatpush3.msra.mxu0 %v4294_v33 }
 0x166   :  { %3272 = vmatprep.subr.mxu1 %v3771_v24  ;;  %3307 = vmatprep.subr.mxu0 %v3771_v24 }
 0x167   :  { %3273 = vmatpush3.msra.mxu1 %v4303_v34  ;;  %3308 = vmatpush3.msra.mxu0 %v4303_v34 }
 0x168   :  { %3274 = vmatprep.subr.mxu1 %v3771_v24  ;;  %3309 = vmatprep.subr.mxu0 %v3771_v24 }
 0x169   :  { %3275 = vmatpush3.msra.mxu1 %v4312_v35  ;;  %3310 = vmatpush3.msra.mxu0 %v4312_v35 }
 0x16a   :  { %3276 = vmatprep.subr.mxu1 %v3771_v24  ;;  %3311 = vmatprep.subr.mxu0 %v3771_v24 }
 0x16b   :  { %3277 = vmatpush3.msra.mxu1 %v4321_v36  ;;  %3312 = vmatpush3.msra.mxu0 %v4321_v36 }
 0x16c   :  { %3278 = vmatprep.subr.mxu1 %v3771_v24  ;;  %3313 = vmatprep.subr.mxu0 %v3771_v24 }
 0x16d   :  { %3279 = vmatpush3.msra.mxu1 %v4330_v37  ;;  %3314 = vmatpush3.msra.mxu0 %v4330_v37 }
 0x16e   :  { %3280 = vmatprep.subr.mxu1 %v3771_v24  ;;  %3315 = vmatprep.subr.mxu0 %v3771_v24 }
 0x16f   :  { %3281 = vmatpush3.msra.mxu1 %v4339_v38  ;;  %3316 = vmatpush3.msra.mxu0 %v4339_v38 }
 0x170   :  { %3282 = vmatprep.subr.mxu1 %v3771_v24  ;;  %3317 = vmatprep.subr.mxu0 %v3771_v24 }
 0x171   :  { %3283 = vmatpush3.msra.mxu1 %v4348_v39  ;;  %3318 = vmatpush3.msra.mxu0 %v4348_v39 }
 0x172   :  { %3284 = vmatprep.subr.mxu1 %v3771_v24  ;;  %3319 = vmatprep.subr.mxu0 %v3771_v24 }
 0x173   :  { %3285 = vmatpush3.msra.mxu1 %v4357_v40  ;;  %3286 = vmatprep.mubr.msk.f32.mxu1 %vm3772_vm0, %v3771_v24 }
 0x174   :  { %3320 = vmatpush3.msra.mxu0 %v4357_v40  ;;  %3321 = vmatprep.mubr.msk.f32.mxu0 %vm3772_vm0, %v3771_v24 }
 0x175   :  { %3287 = vmatmul.mubr.f32.vlgmr.msra.gmra.mxu1 %v1768_v61  ;;  %3322 = vmatmul.mubr.f32.vlgmr.msra.gmra.mxu0 %v1860_v62 }
 0x176   :  { %3324 = vmatprep.subr.mxu1 %v3771_v24  ;;  %3359 = vmatprep.subr.mxu0 %v3771_v24 }
 0x177   :  { %3325 = vmatpush3.msra.mxu1 %v4226_v25  ;;  %3360 = vmatpush3.msra.mxu0 %v4226_v25 }
 0x178   :  { %3326 = vmatprep.subr.mxu1 %v3771_v24  ;;  %3361 = vmatprep.subr.mxu0 %v3771_v24 }
 0x179   :  { %3327 = vmatpush3.msra.mxu1 %v4232_v26  ;;  %3362 = vmatpush3.msra.mxu0 %v4232_v26 }
 0x17a   :  { %3328 = vmatprep.subr.mxu1 %v3771_v24  ;;  %3363 = vmatprep.subr.mxu0 %v3771_v24 }
 0x17b   :  { %3329 = vmatpush3.msra.mxu1 %v4239_v27  ;;  %3364 = vmatpush3.msra.mxu0 %v4239_v27 }
 0x17c   :  { %3330 = vmatprep.subr.mxu1 %v3771_v24  ;;  %3365 = vmatprep.subr.mxu0 %v3771_v24 }
 0x17d   :  { %3331 = vmatpush3.msra.mxu1 %v4248_v28  ;;  %3366 = vmatpush3.msra.mxu0 %v4248_v28 }
 0x17e   :  { %3332 = vmatprep.subr.mxu1 %v3771_v24  ;;  %3367 = vmatprep.subr.mxu0 %v3771_v24 }
 0x17f   :  { %3333 = vmatpush3.msra.mxu1 %v4257_v29  ;;  %3368 = vmatpush3.msra.mxu0 %v4257_v29 }
 0x180   :  { %3334 = vmatprep.subr.mxu1 %v3771_v24  ;;  %3369 = vmatprep.subr.mxu0 %v3771_v24 }
 0x181   :  { %3335 = vmatpush3.msra.mxu1 %v4267_v30  ;;  %3370 = vmatpush3.msra.mxu0 %v4267_v30 }
 0x182   :  { %3336 = vmatprep.subr.mxu1 %v3771_v24  ;;  %3371 = vmatprep.subr.mxu0 %v3771_v24 }
 0x183   :  { %3337 = vmatpush3.msra.mxu1 %v4276_v31  ;;  %3372 = vmatpush3.msra.mxu0 %v4276_v31 }
 0x184   :  { %3338 = vmatprep.subr.mxu1 %v3771_v24  ;;  %3373 = vmatprep.subr.mxu0 %v3771_v24 }
 0x185   :  { %3339 = vmatpush3.msra.mxu1 %v4285_v32  ;;  %3374 = vmatpush3.msra.mxu0 %v4285_v32 }
 0x186   :  { %3340 = vmatprep.subr.mxu1 %v3771_v24  ;;  %3375 = vmatprep.subr.mxu0 %v3771_v24 }
 0x187   :  { %3341 = vmatpush3.msra.mxu1 %v4294_v33  ;;  %3376 = vmatpush3.msra.mxu0 %v4294_v33 }
 0x188   :  { %3342 = vmatprep.subr.mxu1 %v3771_v24  ;;  %3377 = vmatprep.subr.mxu0 %v3771_v24 }
 0x189   :  { %3343 = vmatpush3.msra.mxu1 %v4303_v34  ;;  %3378 = vmatpush3.msra.mxu0 %v4303_v34 }
 0x18a   :  { %3344 = vmatprep.subr.mxu1 %v3771_v24  ;;  %3379 = vmatprep.subr.mxu0 %v3771_v24 }
 0x18b   :  { %3345 = vmatpush3.msra.mxu1 %v4312_v35  ;;  %3380 = vmatpush3.msra.mxu0 %v4312_v35 }
 0x18c   :  { %3346 = vmatprep.subr.mxu1 %v3771_v24  ;;  %3381 = vmatprep.subr.mxu0 %v3771_v24 }
 0x18d   :  { %3347 = vmatpush3.msra.mxu1 %v4321_v36  ;;  %3382 = vmatpush3.msra.mxu0 %v4321_v36 }
 0x18e   :  { %3348 = vmatprep.subr.mxu1 %v3771_v24  ;;  %3383 = vmatprep.subr.mxu0 %v3771_v24 }
 0x18f   :  { %3349 = vmatpush3.msra.mxu1 %v4330_v37  ;;  %3384 = vmatpush3.msra.mxu0 %v4330_v37 }
 0x190   :  { %3350 = vmatprep.subr.mxu1 %v3771_v24  ;;  %3385 = vmatprep.subr.mxu0 %v3771_v24 }
 0x191   :  { %3351 = vmatpush3.msra.mxu1 %v4339_v38  ;;  %3386 = vmatpush3.msra.mxu0 %v4339_v38 }
 0x192   :  { %3352 = vmatprep.subr.mxu1 %v3771_v24  ;;  %3387 = vmatprep.subr.mxu0 %v3771_v24 }
 0x193   :  { %3353 = vmatpush3.msra.mxu1 %v4348_v39  ;;  %3388 = vmatpush3.msra.mxu0 %v4348_v39 }
 0x194   :  { %3354 = vmatprep.subr.mxu1 %v3771_v24  ;;  %3389 = vmatprep.subr.mxu0 %v3771_v24 }
 0x195   :  { %3355 = vmatpush3.msra.mxu1 %v4357_v40  ;;  %3356 = vmatprep.mubr.msk.f32.mxu1 %vm3772_vm0, %v3771_v24 }
 0x196   :  { %3390 = vmatpush3.msra.mxu0 %v4357_v40  ;;  %3391 = vmatprep.mubr.msk.f32.mxu0 %vm3772_vm0, %v3771_v24 }
 0x197   :  { %3357 = vmatmul.mubr.f32.vlgmr.msra.gmra.mxu1 %v1952_v11  ;;  %3392 = vmatmul.mubr.f32.vlgmr.msra.gmra.mxu0 %v2044_v12 }
 0x198   :  { %3394 = vmatprep.subr.mxu1 %v3771_v24  ;;  %3429 = vmatprep.subr.mxu0 %v3771_v24 }
 0x199   :  { %3395 = vmatpush3.msra.mxu1 %v4226_v25  ;;  %3430 = vmatpush3.msra.mxu0 %v4226_v25 }
 0x19a   :  { %3396 = vmatprep.subr.mxu1 %v3771_v24  ;;  %3431 = vmatprep.subr.mxu0 %v3771_v24 }
 0x19b   :  { %3397 = vmatpush3.msra.mxu1 %v4232_v26  ;;  %3432 = vmatpush3.msra.mxu0 %v4232_v26 }
 0x19c   :  { %3398 = vmatprep.subr.mxu1 %v3771_v24  ;;  %3433 = vmatprep.subr.mxu0 %v3771_v24 }
 0x19d   :  { %3399 = vmatpush3.msra.mxu1 %v4239_v27  ;;  %3434 = vmatpush3.msra.mxu0 %v4239_v27 }
 0x19e   :  { %3400 = vmatprep.subr.mxu1 %v3771_v24  ;;  %3435 = vmatprep.subr.mxu0 %v3771_v24 }
 0x19f   :  { %3401 = vmatpush3.msra.mxu1 %v4248_v28  ;;  %3436 = vmatpush3.msra.mxu0 %v4248_v28 }
 0x1a0   :  { %3402 = vmatprep.subr.mxu1 %v3771_v24  ;;  %3437 = vmatprep.subr.mxu0 %v3771_v24 }
 0x1a1   :  { %3403 = vmatpush3.msra.mxu1 %v4257_v29  ;;  %3438 = vmatpush3.msra.mxu0 %v4257_v29 }
 0x1a2   :  { %3404 = vmatprep.subr.mxu1 %v3771_v24  ;;  %3439 = vmatprep.subr.mxu0 %v3771_v24 }
 0x1a3   :  { %3405 = vmatpush3.msra.mxu1 %v4267_v30  ;;  %3440 = vmatpush3.msra.mxu0 %v4267_v30 }
 0x1a4   :  { %3406 = vmatprep.subr.mxu1 %v3771_v24  ;;  %3441 = vmatprep.subr.mxu0 %v3771_v24 }
 0x1a5   :  { %3407 = vmatpush3.msra.mxu1 %v4276_v31  ;;  %3442 = vmatpush3.msra.mxu0 %v4276_v31 }
 0x1a6   :  { %3408 = vmatprep.subr.mxu1 %v3771_v24  ;;  %3443 = vmatprep.subr.mxu0 %v3771_v24 }
 0x1a7   :  { %3409 = vmatpush3.msra.mxu1 %v4285_v32  ;;  %3444 = vmatpush3.msra.mxu0 %v4285_v32 }
 0x1a8   :  { %3410 = vmatprep.subr.mxu1 %v3771_v24  ;;  %3445 = vmatprep.subr.mxu0 %v3771_v24 }
 0x1a9   :  { %3411 = vmatpush3.msra.mxu1 %v4294_v33  ;;  %3446 = vmatpush3.msra.mxu0 %v4294_v33 }
 0x1aa   :  { %3412 = vmatprep.subr.mxu1 %v3771_v24  ;;  %3447 = vmatprep.subr.mxu0 %v3771_v24 }
 0x1ab   :  { %3413 = vmatpush3.msra.mxu1 %v4303_v34  ;;  %3448 = vmatpush3.msra.mxu0 %v4303_v34 }
 0x1ac   :  { %3414 = vmatprep.subr.mxu1 %v3771_v24  ;;  %3449 = vmatprep.subr.mxu0 %v3771_v24 }
 0x1ad   :  { %3415 = vmatpush3.msra.mxu1 %v4312_v35  ;;  %3450 = vmatpush3.msra.mxu0 %v4312_v35 }
 0x1ae   :  { %3416 = vmatprep.subr.mxu1 %v3771_v24  ;;  %3451 = vmatprep.subr.mxu0 %v3771_v24 }
 0x1af   :  { %3417 = vmatpush3.msra.mxu1 %v4321_v36  ;;  %3452 = vmatpush3.msra.mxu0 %v4321_v36 }
 0x1b0   :  { %3418 = vmatprep.subr.mxu1 %v3771_v24  ;;  %3453 = vmatprep.subr.mxu0 %v3771_v24 }
 0x1b1   :  { %3419 = vmatpush3.msra.mxu1 %v4330_v37  ;;  %3454 = vmatpush3.msra.mxu0 %v4330_v37 }
 0x1b2   :  { %3420 = vmatprep.subr.mxu1 %v3771_v24  ;;  %3455 = vmatprep.subr.mxu0 %v3771_v24 }
 0x1b3   :  { %3421 = vmatpush3.msra.mxu1 %v4339_v38  ;;  %3456 = vmatpush3.msra.mxu0 %v4339_v38 }
 0x1b4   :  { %3422 = vmatprep.subr.mxu1 %v3771_v24  ;;  %3457 = vmatprep.subr.mxu0 %v3771_v24 }
 0x1b5   :  { %3423 = vmatpush3.msra.mxu1 %v4348_v39  ;;  %3458 = vmatpush3.msra.mxu0 %v4348_v39 }
 0x1b6   :  { %3424 = vmatprep.subr.mxu1 %v3771_v24  ;;  %3459 = vmatprep.subr.mxu0 %v3771_v24 }
 0x1b7   :  { %3425 = vmatpush3.msra.mxu1 %v4357_v40  ;;  %3426 = vmatprep.mubr.msk.f32.mxu1 %vm3772_vm0, %v3771_v24 }
 0x1b8   :  { %3460 = vmatpush3.msra.mxu0 %v4357_v40  ;;  %3461 = vmatprep.mubr.msk.f32.mxu0 %vm3772_vm0, %v3771_v24 }
 0x1b9   :  { %3427 = vmatmul.mubr.f32.vlgmr.msra.gmra.mxu1 %v2136_v21  ;;  %3462 = vmatmul.mubr.f32.vlgmr.msra.gmra.mxu0 %v2228_v22 }
 0x1ba   :  { %3464 = vmatprep.subr.mxu1 %v3771_v24  ;;  %3499 = vmatprep.subr.mxu0 %v3771_v24 }
 0x1bb   :  { %3465 = vmatpush3.msra.mxu1 %v4226_v25  ;;  %3500 = vmatpush3.msra.mxu0 %v4226_v25 }
 0x1bc   :  { %3466 = vmatprep.subr.mxu1 %v3771_v24  ;;  %3501 = vmatprep.subr.mxu0 %v3771_v24 }
 0x1bd   :  { %3467 = vmatpush3.msra.mxu1 %v4232_v26  ;;  %3502 = vmatpush3.msra.mxu0 %v4232_v26 }
 0x1be   :  { %3468 = vmatprep.subr.mxu1 %v3771_v24  ;;  %3503 = vmatprep.subr.mxu0 %v3771_v24 }
 0x1bf   :  { %3469 = vmatpush3.msra.mxu1 %v4239_v27  ;;  %3504 = vmatpush3.msra.mxu0 %v4239_v27 }
 0x1c0   :  { %3470 = vmatprep.subr.mxu1 %v3771_v24  ;;  %3505 = vmatprep.subr.mxu0 %v3771_v24 }
 0x1c1   :  { %3471 = vmatpush3.msra.mxu1 %v4248_v28  ;;  %3506 = vmatpush3.msra.mxu0 %v4248_v28 }
 0x1c2   :  { %3472 = vmatprep.subr.mxu1 %v3771_v24  ;;  %3507 = vmatprep.subr.mxu0 %v3771_v24 }
 0x1c3   :  { %3473 = vmatpush3.msra.mxu1 %v4257_v29  ;;  %3508 = vmatpush3.msra.mxu0 %v4257_v29 }
 0x1c4   :  { %3474 = vmatprep.subr.mxu1 %v3771_v24  ;;  %3509 = vmatprep.subr.mxu0 %v3771_v24 }
 0x1c5   :  { %3475 = vmatpush3.msra.mxu1 %v4267_v30  ;;  %3510 = vmatpush3.msra.mxu0 %v4267_v30 }
 0x1c6   :  { %3476 = vmatprep.subr.mxu1 %v3771_v24  ;;  %3511 = vmatprep.subr.mxu0 %v3771_v24 }
 0x1c7   :  { %3477 = vmatpush3.msra.mxu1 %v4276_v31  ;;  %3512 = vmatpush3.msra.mxu0 %v4276_v31 }
 0x1c8   :  { %3478 = vmatprep.subr.mxu1 %v3771_v24  ;;  %3513 = vmatprep.subr.mxu0 %v3771_v24 }
 0x1c9   :  { %3479 = vmatpush3.msra.mxu1 %v4285_v32  ;;  %3514 = vmatpush3.msra.mxu0 %v4285_v32 }
 0x1ca   :  { %3480 = vmatprep.subr.mxu1 %v3771_v24  ;;  %3515 = vmatprep.subr.mxu0 %v3771_v24 }
 0x1cb   :  { %3481 = vmatpush3.msra.mxu1 %v4294_v33  ;;  %3516 = vmatpush3.msra.mxu0 %v4294_v33 }
 0x1cc   :  { %3482 = vmatprep.subr.mxu1 %v3771_v24  ;;  %3517 = vmatprep.subr.mxu0 %v3771_v24 }
 0x1cd   :  { %3483 = vmatpush3.msra.mxu1 %v4303_v34  ;;  %3518 = vmatpush3.msra.mxu0 %v4303_v34 }
 0x1ce   :  { %3484 = vmatprep.subr.mxu1 %v3771_v24  ;;  %3519 = vmatprep.subr.mxu0 %v3771_v24 }
 0x1cf   :  { %3485 = vmatpush3.msra.mxu1 %v4312_v35  ;;  %3520 = vmatpush3.msra.mxu0 %v4312_v35 }
 0x1d0   :  { %v4694_v43 = vpop.f32.mrf.mxu0  ;;  %3486 = vmatprep.subr.mxu1 %v3771_v24  ;;  %3521 = vmatprep.subr.mxu0 %v3771_v24 }
 0x1d1   :  { %3487 = vmatpush3.msra.mxu1 %v4321_v36  ;;  %3522 = vmatpush3.msra.mxu0 %v4321_v36 }
 0x1d2   :  { %v3183_v46 = vpop.f32.mrf.mxu0  ;;  %3488 = vmatprep.subr.mxu1 %v3771_v24  ;;  %3523 = vmatprep.subr.mxu0 %v3771_v24 }
 0x1d3   :  { %3489 = vmatpush3.msra.mxu1 %v4330_v37  ;;  %3524 = vmatpush3.msra.mxu0 %v4330_v37 }
 0x1d4   :  { %3490 = vmatprep.subr.mxu1 %v3771_v24  ;;  %3525 = vmatprep.subr.mxu0 %v3771_v24 }
 0x1d5   :  { %3491 = vmatpush3.msra.mxu1 %v4339_v38  ;;  %3526 = vmatpush3.msra.mxu0 %v4339_v38 }
 0x1d6   :  { %3492 = vmatprep.subr.mxu1 %v3771_v24  ;;  %3527 = vmatprep.subr.mxu0 %v3771_v24 }
 0x1d7   :  { %3493 = vmatpush3.msra.mxu1 %v4348_v39  ;;  %3528 = vmatpush3.msra.mxu0 %v4348_v39 }
 0x1d8   :  { %3494 = vmatprep.subr.mxu1 %v3771_v24  ;;  %3529 = vmatprep.subr.mxu0 %v3771_v24 }
 0x1d9   :  { %3495 = vmatpush3.msra.mxu1 %v4357_v40  ;;  %3496 = vmatprep.mubr.msk.f32.mxu1 %vm3772_vm0, %v3771_v24 }
 0x1da   :  { %3530 = vmatpush3.msra.mxu0 %v4357_v40  ;;  %3531 = vmatprep.mubr.msk.f32.mxu0 %vm3772_vm0, %v3771_v24 }
 0x1db   :  { %3497 = vmatmul.mubr.f32.vlgmr.msra.gmra.mxu1 %v2320_v51  ;;  %3532 = vmatmul.mubr.f32.vlgmr.msra.gmra.mxu0 %v2412_v52 }
 0x1dc   :  { %3534 = vmatprep.subr.mxu1 %v3771_v24  ;;  %3566 = vmatprep.mubr.msk.f32.mxu1 %vm3772_vm0, %v3771_v24 }
 0x1dd   :  { %3535 = vmatpush3.msra.mxu1 %v4226_v25  ;;  %v1437_v25 = vlaneseq }
 0x1de   :  { %3536 = vmatprep.subr.mxu1 %v3771_v24 }
 0x1df   :  { %3537 = vmatpush3.msra.mxu1 %v4232_v26  ;;  %v4761_v26 = vld [vmem:[%s4895_s6] ss:$0 sm:$0xff] }
 0x1e0   :  { %3538 = vmatprep.subr.mxu1 %v3771_v24 }
 0x1e1   :  { %3539 = vmatpush3.msra.mxu1 %v4239_v27 }
 0x1e2   :  { %3540 = vmatprep.subr.mxu1 %v3771_v24 }
 0x1e3   :  { %3541 = vmatpush3.msra.mxu1 %v4248_v28 }
 0x1e4   :  { %3542 = vmatprep.subr.mxu1 %v3771_v24 }
 0x1e5   :  { %3543 = vmatpush3.msra.mxu1 %v4257_v29  ;;  %v4763_v29 = vand.u32 127, %v1437_v25 }
 0x1e6   :  { %3544 = vmatprep.subr.mxu1 %v3771_v24 }
 0x1e7   :  { %3545 = vmatpush3.msra.mxu1 %v4267_v30  ;;  %vm1439_vm1 = vcmp.lt.s32.totalorder %v4763_v29, 10  ;;  %vm2595_vm13 = vcmp.eq.s32.totalorder %v4763_v29, 1  ;;  %vm2593_vm14 = vcmp.eq.s32.totalorder %v4763_v29, 0  ;;  %vm2598_vm15 = vcmp.eq.s32.totalorder %v4763_v29, 2 }
 0x1e8   :  { %3546 = vmatprep.subr.mxu1 %v3771_v24  ;;  %vm2601_vm0 = vcmp.eq.s32.totalorder %v4763_v29, 3 }
 0x1e9   :  { %3547 = vmatpush3.msra.mxu1 %v4276_v31 }
 0x1ea   :  { %3548 = vmatprep.subr.mxu1 %v3771_v24 }
 0x1eb   :  { %3549 = vmatpush3.msra.mxu1 %v4285_v32 }
 0x1ec   :  { %3550 = vmatprep.subr.mxu1 %v3771_v24 }
 0x1ed   :  { %3551 = vmatpush3.msra.mxu1 %v4294_v33 }
 0x1ee   :  { %3552 = vmatprep.subr.mxu1 %v3771_v24 }
 0x1ef   :  { %3553 = vmatpush3.msra.mxu1 %v4303_v34 }
 0x1f0   :  { %3554 = vmatprep.subr.mxu1 %v3771_v24 }
 0x1f1   :  { %3555 = vmatpush3.msra.mxu1 %v4312_v35 }
 0x1f2   :  { %3556 = vmatprep.subr.mxu1 %v3771_v24 }
 0x1f3   :  { %3557 = vmatpush3.msra.mxu1 %v4321_v36 }
 0x1f4   :  { %3558 = vmatprep.subr.mxu1 %v3771_v24 }
 0x1f5   :  { %3559 = vmatpush3.msra.mxu1 %v4330_v37 }
 0x1f6   :  { %3560 = vmatprep.subr.mxu1 %v3771_v24 }
 0x1f7   :  { %3561 = vmatpush3.msra.mxu1 %v4339_v38 }
 0x1f8   :  { %3562 = vmatprep.subr.mxu1 %v3771_v24 }
 0x1f9   :  { %3563 = vmatpush3.msra.mxu1 %v4348_v39 }
 0x1fa   :  { %3564 = vmatprep.subr.mxu1 %v3771_v24 }
 0x1fb   :  { %3565 = vmatpush3.msra.mxu1 %v4357_v40 }
 0x214   :  { %v1651_v27 = vpop.f32.mrf.mxu1  ;;  %v1743_v28 = vpop.f32.mrf.mxu0 }
 0x215   :  { %v1652_v30 = vadd.f32 %v4761_v26, %v1651_v27  ;;  %v1744_v31 = vadd.f32 %v4761_v26, %v1743_v28 }
 0x216   :  { %v3218_v32 = vpop.f32.mrf.mxu1  ;;  %v3253_v33 = vpop.f32.mrf.mxu0 }
 0x217   :  { %v2758_v34 = vclamps-f32 %v1652_v30, 10.0  ;;  %v2759_v35 = vclamps-f32 %v1744_v31, 10.0 }
 0x219   :  { %v1657_v36 = vsel %vm1439_vm1, %v2758_v34, -1e+30  ;;  %v1749_v37 = vsel %vm1439_vm1, %v2759_v35, -1e+30 }
 0x21a   :  { %1658 = vmax.xlane.f32.xlu0 %v1657_v36 }
 0x21e   :  { %1750 = vmax.xlane.f32.xlu0 %v1749_v37 }
 0x235   :  { %v1835_v38 = vpop.f32.mrf.mxu1  ;;  %v1927_v39 = vpop.f32.mrf.mxu0 }
 0x236   :  { %v1836_v40 = vadd.f32 %v4761_v26, %v1835_v38  ;;  %v1928_v63 = vadd.f32 %v4761_v26, %v1927_v39 }
 0x237   :  { %v3288_v53 = vpop.f32.mrf.mxu1  ;;  %v3323_v54 = vpop.f32.mrf.mxu0 }
 0x238   :  { %v2760_v55 = vclamps-f32 %v1836_v40, 10.0  ;;  %v2761_v56 = vclamps-f32 %v1928_v63, 10.0 }
 0x23a   :  { %v1841_v57 = vsel %vm1439_vm1, %v2760_v55, -1e+30  ;;  %v1933_v58 = vsel %vm1439_vm1, %v2761_v56, -1e+30 }
 0x23b   :  { %1842 = vmax.xlane.f32.xlu1 %v1841_v57 }
 0x23f   :  { %1934 = vmax.xlane.f32.xlu1 %v1933_v58 }
 0x257   :  { %v2019_v59 = vpop.f32.mrf.mxu1  ;;  %v2111_v60 = vpop.f32.mrf.mxu0 }
 0x258   :  { %v2020_v61 = vadd.f32 %v4761_v26, %v2019_v59  ;;  %v2112_v62 = vadd.f32 %v4761_v26, %v2111_v60 }
 0x259   :  { %v3358_v3 = vpop.f32.mrf.mxu1  ;;  %v3393_v4 = vpop.f32.mrf.mxu0 }
 0x25a   :  { %v2762_v5 = vclamps-f32 %v2020_v61, 10.0  ;;  %v2763_v6 = vclamps-f32 %v2112_v62, 10.0 }
 0x25c   :  { %v2025_v7 = vsel %vm1439_vm1, %v2762_v5, -1e+30  ;;  %v2117_v8 = vsel %vm1439_vm1, %v2763_v6, -1e+30 }
 0x25d   :  { %2026 = vmax.xlane.f32.xlu0 %v2025_v7  ;;  %2118 = vmax.xlane.f32.xlu1 %v2117_v8 }
 0x279   :  { %v2203_v9 = vpop.f32.mrf.mxu1  ;;  %v2295_v10 = vpop.f32.mrf.mxu0 }
 0x27a   :  { %v2204_v11 = vadd.f32 %v4761_v26, %v2203_v9  ;;  %v2296_v12 = vadd.f32 %v4761_v26, %v2295_v10 }
 0x27b   :  { %v3428_v13 = vpop.f32.mrf.mxu1  ;;  %v3463_v14 = vpop.f32.mrf.mxu0 }
 0x27c   :  { %v2764_v15 = vclamps-f32 %v2204_v11, 10.0  ;;  %v2765_v16 = vclamps-f32 %v2296_v12, 10.0  ;;  %v4828_v12 = vadd.f32 %v4761_v26, %v4694_v43  ;;  %v1568_v43 = vld [vmem:[%s4896_s2] sm:$0xff] }
 0x27e   :  { %v2209_v17 = vsel %vm1439_vm1, %v2764_v15, -1e+30  ;;  %v2301_v18 = vsel %vm1439_vm1, %v2765_v16, -1e+30  ;;  %v2756_v14 = vclamps-f32 %v4828_v12, 10.0 }
 0x27f   :  { %2210 = vmax.xlane.f32.xlu0 %v2209_v17  ;;  %2302 = vmax.xlane.f32.xlu1 %v2301_v18 }
 0x280   :  { %v4833_v16 = vsel %vm1439_vm1, %v2756_v14, -1e+30 }
 0x29b   :  { %v2387_v19 = vpop.f32.mrf.mxu1  ;;  %v2479_v20 = vpop.f32.mrf.mxu0 }
 0x29c   :  { %v2388_v21 = vadd.f32 %v4761_v26, %v2387_v19  ;;  %v2480_v22 = vadd.f32 %v4761_v26, %v2479_v20 }
 0x29d   :  { %v3498_v23 = vpop.f32.mrf.mxu1  ;;  %v3533_v42 = vpop.f32.mrf.mxu0 }
 0x29e   :  { %v2766_v44 = vclamps-f32 %v2388_v21, 10.0  ;;  %v2767_v45 = vclamps-f32 %v2480_v22, 10.0 }
 0x2a0   :  { %v2393_v46 = vsel %vm1439_vm1, %v2766_v44, -1e+30  ;;  %v2485_v47 = vsel %vm1439_vm1, %v2767_v45, -1e+30 }
 0x2a1   :  { %2394 = vmax.xlane.f32.xlu0 %v2393_v46  ;;  %2486 = vmax.xlane.f32.xlu1 %v2485_v47 }
 0x2a3   :  { %v4796_v48 = vpop.xlane.xlu0 %1658 }
 0x2a4   :  { %v1660_v49 = vsub.f32 %v1657_v36, %v4796_v48  ;;  %v3773_v36 = vmov 0  }
 0x2a5   :  { %3572 = vset.pattern.permute.xlu1 %v3773_v36  ;;  %3573 = vset.pattern.permute.xlu0 %v3773_v36 }
 0x2a6   :  { %v1661_v50 = vmul.f32 1.442695, %v1660_v49 }
 0x2a7   :  { %v4799_v51 = vpop.xlane.xlu0 %1750 }
 0x2a8   :  { %3718 = vpow2.f32 %v1661_v50  ;;  %v1752_v52 = vsub.f32 %v1749_v37, %v4799_v51 }
 0x2aa   :  { %v1753_v25 = vmul.f32 1.442695, %v1752_v52 }
 0x2ac   :  { %3720 = vpow2.f32 %v1753_v25 }
 0x2b5   :  { %v3719_v27 = vpop.eup %3718 }
 0x2b6   :  { %1663 = vadd.xlane.f32.xlu0 %v3719_v27 }
 0x2b9   :  { %v3721_v28 = vpop.eup %3720 }
 0x2ba   :  { %1755 = vadd.xlane.f32.xlu1 %v3721_v28 }
 0x2c4   :  { %v4802_v30 = vpop.xlane.xlu1 %1842 }
 0x2c5   :  { %v1844_v31 = vsub.f32 %v1841_v57, %v4802_v30 }
 0x2c7   :  { %v1845_v32 = vmul.f32 1.442695, %v1844_v31 }
 0x2c8   :  { %v4805_v33 = vpop.xlane.xlu1 %1934 }
 0x2c9   :  { %3722 = vpow2.f32 %v1845_v32  ;;  %v1936_v34 = vsub.f32 %v1933_v58, %v4805_v33 }
 0x2cb   :  { %v1937_v35 = vmul.f32 1.442695, %v1936_v34 }
 0x2cd   :  { %3724 = vpow2.f32 %v1937_v35 }
 0x2d6   :  { %v3723_v37 = vpop.eup %3722 }
 0x2d7   :  { %1847 = vadd.xlane.f32.xlu0 %v3723_v37 }
 0x2da   :  { %v3725_v38 = vpop.eup %3724 }
 0x2db   :  { %1939 = vadd.xlane.f32.xlu1 %v3725_v38 }
 0x2e6   :  { %v4808_v39 = vpop.xlane.xlu0 %2026  ;;  %v4810_v40 = vpop.xlane.xlu1 %2118 }
 0x2e7   :  { %v2028_v63 = vsub.f32 %v2025_v7, %v4808_v39  ;;  %v2120_v53 = vsub.f32 %v2117_v8, %v4810_v40 }
 0x2e9   :  { %v2029_v54 = vmul.f32 1.442695, %v2028_v63  ;;  %v2121_v55 = vmul.f32 1.442695, %v2120_v53 }
 0x2eb   :  { %3726 = vpow2.f32 %v2029_v54 }
 0x2ec   :  { %3728 = vpow2.f32 %v2121_v55 }
 0x2f8   :  { %v3727_v56 = vpop.eup %3726 }
 0x2f9   :  { %v3729_v57 = vpop.eup %3728  ;;  %2031 = vadd.xlane.f32.xlu0 %v3727_v56 }
 0x2fa   :  { %2123 = vadd.xlane.f32.xlu1 %v3729_v57 }
 0x308   :  { %v4814_v58 = vpop.xlane.xlu0 %2210  ;;  %v4816_v59 = vpop.xlane.xlu1 %2302 }
 0x309   :  { %v2212_v60 = vsub.f32 %v2209_v17, %v4814_v58  ;;  %v2304_v61 = vsub.f32 %v2301_v18, %v4816_v59  ;;  %v4839_v17 = vsel %vm1439_vm1, %v4828_v12, -1e+30 }
 0x30b   :  { %v2213_v62 = vmul.f32 1.442695, %v2212_v60  ;;  %v2305_v3 = vmul.f32 1.442695, %v2304_v61 }
 0x30d   :  { %3730 = vpow2.f32 %v2213_v62 }
 0x30e   :  { %3732 = vpow2.f32 %v2305_v3 }
 0x31a   :  { %v3731_v4 = vpop.eup %3730 }
 0x31b   :  { %v3733_v5 = vpop.eup %3732  ;;  %2215 = vadd.xlane.f32.xlu0 %v3731_v4 }
 0x31c   :  { %2307 = vadd.xlane.f32.xlu1 %v3733_v5 }
 0x32a   :  { %v4820_v6 = vpop.xlane.xlu0 %2394  ;;  %v4822_v7 = vpop.xlane.xlu1 %2486 }
 0x32b   :  { %v2396_v8 = vsub.f32 %v2393_v46, %v4820_v6  ;;  %v2488_v9 = vsub.f32 %v2485_v47, %v4822_v7 }
 0x32d   :  { %v2397_v10 = vmul.f32 1.442695, %v2396_v8  ;;  %v2489_v11 = vmul.f32 1.442695, %v2488_v9 }
 0x32f   :  { %3734 = vpow2.f32 %v2397_v10 }
 0x330   :  { %3736 = vpow2.f32 %v2489_v11 }
 0x33c   :  { %v3735_v13 = vpop.eup %3734 }
 0x33d   :  { %v3737_v15 = vpop.eup %3736  ;;  %2399 = vadd.xlane.f32.xlu0 %v3735_v13 }
 0x33e   :  { %2491 = vadd.xlane.f32.xlu1 %v3737_v15 }
 0x33f   :  { %v1664_v18 = vpop.xlane.xlu0 %1663 }
 0x340   :  { %3738 = vlog2.f32 %v1664_v18 }
 0x341   :  { %1546 = vmax.xlane.f32.xlu0 %v4833_v16 }
 0x342   :  { %1558 = vmax.xlane.f32.xlu1 %v4839_v17 }
 0x343   :  { %v1756_v19 = vpop.xlane.xlu1 %1755 }
 0x344   :  { %3740 = vlog2.f32 %v1756_v19 }
 0x34d   :  { %v3739_v22 = vpop.eup %3738 }
 0x34e   :  { %v1666_v42 = vmul.f32 0.6931472, %v3739_v22 }
 0x350   :  { %v1667_v45 = vadd.f32 %v1666_v42, %v4796_v48 }
 0x351   :  { %v3741_v44 = vpop.eup %3740 }
 0x352   :  { %v1758_v46 = vmul.f32 0.6931472, %v3741_v44  ;;  %v1668_v52 = vmul.f32 -1.0, %v1667_v45 }
 0x353   :  { %1570 = vperm.xlu1 %3572, %v1568_v43  }
 0x354   :  { %v1759_v25 = vadd.f32 %v1758_v46, %v4799_v51  ;;  %vm1669_vm2 = vcmp.gt.f32.partialorder %v1668_v52, -inf }
 0x355   :  { %v1670_v36 = vsel %vm1669_vm2, %v1668_v52, -inf  ;;  %v1671_v13 = vsel %vm1669_vm2, 0.2, %v3771_v24 }
 0x356   :  { %v1760_v31 = vmul.f32 -1.0, %v1759_v25 }
 0x358   :  { %vm1761_vm3 = vcmp.gt.f32.partialorder %v1760_v31, %v1670_v36 }
 0x359   :  { %v1762_v51 = vsel %vm1761_vm3, %v1760_v31, %v1670_v36  ;;  %v1763_v15 = vsel %vm1761_vm3, 0.26666668, %v1671_v13 }
 0x360   :  { %v1848_v20 = vpop.xlane.xlu0 %1847 }
 0x361   :  { %3742 = vlog2.f32 %v1848_v20 }
 0x364   :  { %v1940_v21 = vpop.xlane.xlu1 %1939 }
 0x365   :  { %3744 = vlog2.f32 %v1940_v21 }
 0x36e   :  { %v3743_v47 = vpop.eup %3742 }
 0x36f   :  { %v1850_v27 = vmul.f32 0.6931472, %v3743_v47 }
 0x371   :  { %v1851_v32 = vadd.f32 %v1850_v27, %v4802_v30 }
 0x372   :  { %v3745_v28 = vpop.eup %3744 }
 0x373   :  { %v1942_v34 = vmul.f32 0.6931472, %v3745_v28  ;;  %v1852_v37 = vmul.f32 -1.0, %v1851_v32 }
 0x375   :  { %v1943_v38 = vadd.f32 %v1942_v34, %v4805_v33  ;;  %vm1853_vm4 = vcmp.gt.f32.partialorder %v1852_v37, %v1762_v51 }
 0x376   :  { %v1854_v30 = vsel %vm1853_vm4, %v1852_v37, %v1762_v51  ;;  %v1855_v43 = vsel %vm1853_vm4, 0.33333334, %v1763_v15 }
 0x377   :  { %v1944_v53 = vmul.f32 -1.0, %v1943_v38 }
 0x379   :  { %vm1945_vm5 = vcmp.gt.f32.partialorder %v1944_v53, %v1854_v30 }
 0x37a   :  { %v1946_v62 = vsel %vm1945_vm5, %v1944_v53, %v1854_v30 }
 0x382   :  { %v2032_v23 = vpop.xlane.xlu0 %2031 }
 0x383   :  { %3746 = vlog2.f32 %v2032_v23  ;;  %v2124_v49 = vpop.xlane.xlu1 %2123 }
 0x384   :  { %3748 = vlog2.f32 %v2124_v49 }
 0x390   :  { %v3747_v35 = vpop.eup %3746 }
 0x391   :  { %v2034_v63 = vmul.f32 0.6931472, %v3747_v35  ;;  %v3749_v55 = vpop.eup %3748 }
 0x392   :  { %v2126_v60 = vmul.f32 0.6931472, %v3749_v55 }
 0x393   :  { %v2035_v54 = vadd.f32 %v2034_v63, %v4808_v39 }
 0x394   :  { %v2127_v33 = vadd.f32 %v2126_v60, %v4810_v40 }
 0x395   :  { %v2036_v57 = vmul.f32 -1.0, %v2035_v54 }
 0x396   :  { %v2128_v9 = vmul.f32 -1.0, %v2127_v33 }
 0x397   :  { %vm2037_vm6 = vcmp.gt.f32.partialorder %v2036_v57, %v1946_v62 }
 0x398   :  { %v2038_v8 = vsel %vm2037_vm6, %v2036_v57, %v1946_v62 }
 0x399   :  { %vm2129_vm7 = vcmp.gt.f32.partialorder %v2128_v9, %v2038_v8 }
 0x39a   :  { %v2130_v14 = vsel %vm2129_vm7, %v2128_v9, %v2038_v8 }
 0x3a4   :  { %v2216_v50 = vpop.xlane.xlu0 %2215 }
 0x3a5   :  { %3750 = vlog2.f32 %v2216_v50  ;;  %v2308_v48 = vpop.xlane.xlu1 %2307 }
 0x3a6   :  { %3752 = vlog2.f32 %v2308_v48 }
 0x3b2   :  { %v3751_v56 = vpop.eup %3750 }
 0x3b3   :  { %v2218_v61 = vmul.f32 0.6931472, %v3751_v56  ;;  %v3753_v39 = vpop.eup %3752 }
 0x3b4   :  { %v2310_v11 = vmul.f32 0.6931472, %v3753_v39 }
 0x3b5   :  { %v2219_v5 = vadd.f32 %v2218_v61, %v4814_v58  ;;  %v1947_v58 = vsel %vm1945_vm5, 0.4, %v1855_v43 }
 0x3b6   :  { %v2311_v40 = vadd.f32 %v2310_v11, %v4816_v59  ;;  %v2039_v19 = vsel %vm2037_vm6, 0.46666667, %v1947_v58 }
 0x3b7   :  { %v2220_v10 = vmul.f32 -1.0, %v2219_v5  ;;  %v2131_v44 = vsel %vm2129_vm7, 0.53333336, %v2039_v19 }
 0x3b8   :  { %v2312_v22 = vmul.f32 -1.0, %v2311_v40 }
 0x3b9   :  { %vm2221_vm8 = vcmp.gt.f32.partialorder %v2220_v10, %v2130_v14 }
 0x3ba   :  { %v2222_v20 = vsel %vm2221_vm8, %v2220_v10, %v2130_v14  ;;  %v2223_v46 = vsel %vm2221_vm8, 0.6, %v2131_v44 }
 0x3bb   :  { %vm2313_vm9 = vcmp.gt.f32.partialorder %v2312_v22, %v2222_v20 }
 0x3bc   :  { %v2314_v49 = vsel %vm2313_vm9, %v2312_v22, %v2222_v20  ;;  %v2315_v50 = vsel %vm2313_vm9, 0.6666667, %v2223_v46 }
 0x3c6   :  { %v2400_v3 = vpop.xlane.xlu0 %2399 }
 0x3c7   :  { %3754 = vlog2.f32 %v2400_v3  ;;  %v2492_v4 = vpop.xlane.xlu1 %2491 }
 0x3c8   :  { %3756 = vlog2.f32 %v2492_v4 }
 0x3ca   :  { %v1547_v38 = vpop.xlane.xlu0 %1546 }
 0x3cb   :  { %v1548_v63 = vsub.f32 %v4833_v16, %v1547_v38  ;;  %v1559_v51 = vpop.xlane.xlu1 %1558 }
 0x3d4   :  { %v3755_v18 = vpop.eup %3754 }
 0x3d5   :  { %v3757_v21 = vpop.eup %3756  ;;  %v2402_v23 = vmul.f32 0.6931472, %v3755_v18 }
 0x3d6   :  { %v2494_v42 = vmul.f32 0.6931472, %v3757_v21 }
 0x3d7   :  { %v2403_v45 = vadd.f32 %v2402_v23, %v4820_v6  ;;  %v3770_v6 = vld [vmem:[%s4894_s4] ss:$0 sm:$0xff] }
 0x3d8   :  { %v2495_v59 = vadd.f32 %v2494_v42, %v4822_v7 }
 0x3d9   :  { %v2404_v47 = vmul.f32 -1.0, %v2403_v45 }
 0x3da   :  { %v2496_v52 = vmul.f32 -1.0, %v2495_v59 }
 0x3db   :  { %vm2405_vm10 = vcmp.gt.f32.partialorder %v2404_v47, %v2314_v49 }
 0x3dc   :  { %v2407_v25 = vsel %vm2405_vm10, 0.73333335, %v2315_v50  ;;  %v2406_v27 = vsel %vm2405_vm10, %v2404_v47, %v2314_v49 }
 0x3dd   :  { %vm2497_vm11 = vcmp.gt.f32.partialorder %v2496_v52, %v2406_v27 }
 0x3de   :  { %v2498_v28 = vsel %vm2497_vm11, 0.8, %v2407_v25 }
 0x3df   :  { %v2500_v31 = vsub.f32 1.0, %v2498_v28  ;;  %v2499_v32 = vmul.f32 %v2498_v28, %v4377_v0  ;;  %v1549_v0 = vmul.f32 1.442695, %v1548_v63 }
 0x3e1   :  { %v2501_v34 = vmul.f32 %v2500_v31, %v4420_v41  ;;  %v1560_v41 = vsub.f32 %v4839_v17, %v1559_v51  ;;  %3758 = vpow2.f32 %v1549_v0  ;;  %v1571_v17 = vpop.permute.xlu1 %1570 }
 0x3e2   :  { %vm1572_vm12 = vcmp.eq.s32.totalorder %v4763_v29, %v1571_v17 }
 0x3e3   :  { %v2502_v35 = vadd.f32 %v2501_v34, %v2499_v32  ;;  %v1561_v53 = vmul.f32 1.442695, %v1560_v41 }
 0x3e5   :  { %v2503_v7 = vadd.f32 %v3770_v6, %v2502_v35  ;;  %3760 = vpow2.f32 %v1561_v53 }
 0x3e7   :  { %v2504_v36 = vmax.f32 %v2503_v7, 0.0 }
 0x3e9   :  { %3567 = vmatmul.mubr.f32.vlgmr.msra.gmra.mxu1 %v2504_v36  ;;  %v2589_v48 = vsub.f32 %v1449_v2, %v2504_v36 }
 0x3eb   :  { %v2590_v37 = vmul.f32 %v2589_v48, %v2589_v48 }
 0x3ed   :  { %2591 = vadd.xlane.f32.xlu1 %v2590_v37 }
 0x3ee   :  { %v3759_v2 = vpop.eup %3758 }
 0x3f2   :  { %v3761_v57 = vpop.eup %3760 }
 0x476   :  { %v2592_v20 = vpop.xlane.xlu1 %2591 }
 0x477   :  { %v2602_v42 = vsel %vm2601_vm0, %v2592_v20, 0.0 }
 0x4a9   :  { %v2571_v54 = vpop.f32.mrf.mxu1 }
 0x4aa   :  { %v2572_v55 = vadd.f32 %v4761_v26, %v2571_v54  ;;  %v2757_v26 = vsel %vm1572_vm12, 1.0, %v3771_v24 }
 0x4ab   :  { %v3568_v56 = vpop.f32.mrf.mxu1  ;;  %v1575_v3 = vmul.f32 %v2757_v26, %v4828_v12 }
 0x4ac   :  { %v2768_v30 = vclamps-f32 %v2572_v55, 10.0 }
 0x4ae   :  { %v2577_v1 = vsel %vm1439_vm1, %v2768_v30, -1e+30  ;;  %vm2604_vm1 = vcmask 64512  }
 0x4af   :  { %2578 = vmax.xlane.f32.xlu0 %v2577_v1 }
 0x4b3   :  { %1551 = vadd.xlane.f32.xlu0 %v3759_v2 }
 0x4b7   :  { %1563 = vadd.xlane.f32.xlu0 %v3761_v57 }
 0x538   :  { %v2579_v16 = vpop.xlane.xlu0 %2578 }
 0x539   :  { %v2580_v60 = vsub.f32 %v2577_v1, %v2579_v16 }
 0x53b   :  { %v2581_v61 = vmul.f32 1.442695, %v2580_v60 }
 0x53c   :  { %v1552_v33 = vpop.xlane.xlu0 %1551 }
 0x53d   :  { %3762 = vpow2.f32 %v2581_v61 }
 0x53e   :  { %3764 = vlog2.f32 %v1552_v33 }
 0x540   :  { %v1564_v4 = vpop.xlane.xlu0 %1563 }
 0x541   :  { %3766 = vlog2.f32 %v1564_v4 }
 0x54a   :  { %v3763_v62 = vpop.eup %3762 }
 0x54b   :  { %2583 = vadd.xlane.f32.xlu0 %v3763_v62  ;;  %v3765_v39 = vpop.eup %3764 }
 0x54c   :  { %v1554_v9 = vmul.f32 0.6931472, %v3765_v39 }
 0x54e   :  { %v3767_v8 = vpop.eup %3766  ;;  %v1555_v13 = vadd.f32 %v1554_v9, %v1547_v38 }
 0x54f   :  { %1576 = vadd.xlane.f32.xlu0 %v1575_v3  ;;  %v1566_v10 = vmul.f32 0.6931472, %v3767_v8 }
 0x550   :  { %v1556_v12 = vmul.f32 -1.0, %v1555_v13 }
 0x551   :  { %v1567_v14 = vadd.f32 %v1566_v10, %v1559_v51 }
 0x552   :  { %v2594_v19 = vsel %vm2593_vm14, %v1556_v12, 0.0 }
 0x5d4   :  { %v2584_v5 = vpop.xlane.xlu0 %2583 }
 0x5d5   :  { %3768 = vlog2.f32 %v2584_v5 }
 0x5d8   :  { %v1577_v11 = vpop.xlane.xlu0 %1576 }
 0x5d9   :  { %v1578_v15 = vsub.f32 %v1567_v14, %v1577_v11 }
 0x5db   :  { %v2596_v58 = vsel %vm2595_vm13, %v1578_v15, 0.0 }
 0x5dc   :  { %v2597_v21 = vadd.f32 %v2596_v58, %v2594_v19 }
 0x5e2   :  { %v3769_v40 = vpop.eup %3768 }
 0x5e3   :  { %v2586_v24 = vmul.f32 0.6931472, %v3769_v40 }
 0x5e5   :  { %v2587_v43 = vadd.f32 %v2586_v24, %v2579_v16 }
 0x5e7   :  { %v2588_v18 = vmul.f32 -1.0, %v2587_v43 }
 0x5e9   :  { %v2599_v22 = vsel %vm2598_vm15, %v2588_v18, 0.0 }
 0x5ea   :  { %v2600_v23 = vadd.f32 %v2599_v22, %v2597_v21 }
 0x5ec   :  { %v2603_v44 = vadd.f32 %v2602_v42, %v2600_v23 }
 0x5ee   :  { %2605 = vst.msk [vmem:[%s4897_s7] sm:$0xff] %vm2604_vm1, %v2603_v44 }

</bundles_post_ra>
